<compile_context>
chip_gen: v5e
topology: v5e:2x2
jax: 0.10.0
libtpu: 0.0.40
codegen_flags: <defaults>
</compile_context>

<pallas_src>
import jax
import jax.numpy as jnp
from jax.experimental import pallas as pl
from jax.experimental.pallas import tpu as pltpu

NEG_SLOPE = 0.01   # nn.LeakyReLU default negative_slope
BN_EPS = 1e-5      # nn.BatchNorm2d default eps

_TAPS = [(dh, dw) for dh in (-1, 0, 1) for dw in (-1, 0, 1)]   # t == kh*3+kw


def _round_up(v, m):
    return ((v + m - 1) // m) * m


def _make_kernel(N, H, W, Cp, mm_dtype):
    HW = H * W
    NHW = N * HW
    inv_m = 1.0 / float(NHW)

    def leaky(v):
        return jnp.where(v > 0, v, NEG_SLOPE * v)

    def kernel(x_ref, m_ref, w1_ref, g1_ref, b1_ref, w2_ref, g2_ref, b2_ref,
               o_ref):
        masks = m_ref[...]                                     # (8, NHW) f32

        # Pack batch into lanes in-VMEM (128-aligned lane concat) instead of an
        # XLA NCHW->(C,NHW) transpose + HBM round trip.
        x = jnp.concatenate([x_ref[n] for n in range(N)], axis=1)  # (Cp, NHW)

        def conv(z, w_ref):
            # 3x3 SAME conv as 9 per-tap MXU accumulations; masks implement the
            # zero padding (and neutralize cross-image roll wraparound).
            acc = jnp.zeros((Cp, NHW), jnp.float32)
            mrow = 0
            for t, (dh, dw) in enumerate(_TAPS):
                if dh == 0 and dw == 0:
                    v = z                                      # center tap
                else:
                    delta = dh * W + dw
                    v = pltpu.roll(z, shift=(-delta) % NHW, axis=1)
                    v = v * masks[mrow:mrow + 1]
                    mrow += 1
                acc = acc + jnp.dot(w_ref[t].astype(mm_dtype),
                                    v.astype(mm_dtype),
                                    preferred_element_type=jnp.float32)
            return acc

        def bn(v, gamma, beta):
            # Training-mode batch stats.  sum and sum-of-squares are stacked on
            # the sublane axis -> a single XLU lane reduction per BN.
            r = jnp.sum(jnp.concatenate([v, v * v], axis=0),
                        axis=1, keepdims=True)                 # (2*Cp, 1)
            mean = r[:Cp] * inv_m
            var = r[Cp:] * inv_m - mean * mean                 # biased variance
            scale = gamma * jax.lax.rsqrt(var + BN_EPS)        # (Cp, 1)
            shift = beta - mean * scale                        # (Cp, 1)
            return v * scale + shift

        # conv1 -> LeakyReLU -> BN1 -> conv2 -> BN2   (module order)
        o1 = bn(leaky(conv(x, w1_ref)), g1_ref[...], b1_ref[...])
        o2 = bn(conv(o1, w2_ref), g2_ref[...], b2_ref[...])

        # residual add (downsample=None => identity) + LeakyReLU
        y = leaky(o2 + x)

        # Split batch back out of the lane axis (128-aligned slices).
        for n in range(N):
            o_ref[n] = y[:, n * HW:(n + 1) * HW]

    return kernel


def _border_masks(N, H, W):
    """(8, N*H*W) f32: one row per non-center tap, 1.0 where the tap's source
    pixel is inside the image, 0.0 where the conv's zero-padding applies."""
    q = jnp.arange(N * H * W) % (H * W)
    hh = q // W
    ww = q % W
    rows = []
    for dh, dw in _TAPS:
        if dh == 0 and dw == 0:
            continue
        m = jnp.ones((N * H * W,), jnp.bool_)
        if dh > 0:
            m = m & (hh < H - dh)
        if dh < 0:
            m = m & (hh >= -dh)
        if dw > 0:
            m = m & (ww < W - dw)
        if dw < 0:
            m = m & (ww >= -dw)
        rows.append(m.astype(jnp.float32))
    return jnp.stack(rows, axis=0)


def basic_block(x_nchw, w1, g1, b1, w2, g2, b2, *, mm_dtype=jnp.float32):
    """x_nchw: (N, C, H, W) float32.  w1/w2: (Cout, Cin, 3, 3) PyTorch layout.
    mm_dtype: dtype of the matmul operands (jnp.bfloat16 recommended on v5e,
    at the cost of ~1e-3 level conv error)."""
    N, C, H, W = x_nchw.shape
    Cout, Cin, KH, KW = w1.shape
    assert (KH, KW) == (3, 3) and Cin == C and Cout == C, \
        "identity residual requires inplanes == planes, stride 1"
    HW = H * W
    Cp = _round_up(C, 8)   # pad channels to one sublane tile

    # Layout plumbing: reshape (free) + channel pad only -- no XLA transposes.
    x3 = x_nchw.astype(jnp.float32).reshape(N, C, HW)
    xk = jnp.pad(x3, ((0, 0), (0, Cp - C), (0, 0)))            # (N, Cp, HW)

    masks = _border_masks(N, H, W)                             # (8, N*HW)

    def pack_w(w):
        # wp[kh*3+kw, co, ci] = w[co, ci, kh, kw], zero-padded channels.
        wp = jnp.pad(w.astype(jnp.float32),
                     ((0, Cp - C), (0, Cp - C), (0, 0), (0, 0)))
        return jnp.transpose(wp, (2, 3, 0, 1)).reshape(9, Cp, Cp)

    def pack_v(v):
        return jnp.pad(v.astype(jnp.float32), (0, Cp - C)).reshape(Cp, 1)

    w1p, w2p = pack_w(w1), pack_w(w2)
    g1r, b1r = pack_v(g1), pack_v(b1)
    g2r, b2r = pack_v(g2), pack_v(b2)

    vmem = pl.BlockSpec(memory_space=pltpu.MemorySpace.VMEM)
    out = pl.pallas_call(
        _make_kernel(N, H, W, Cp, mm_dtype),
        out_shape=jax.ShapeDtypeStruct((N, Cp, HW), jnp.float32),
        in_specs=[vmem] * 8,
        out_specs=vmem,
    )(xk, masks, w1p, g1r, b1r, w2p, g2r, b2r)

    # Drop channel padding; reshape back to NCHW (free).
    return out[:, :C, :].reshape(N, C, H, W)


def basic_block_reference(x_nchw, w1, g1, b1, w2, g2, b2):
    """Pure-JAX reference for correctness checking."""
    x = jnp.transpose(x_nchw, (0, 2, 3, 1)).astype(jnp.float32)

    def conv(z, w):
        wk = jnp.transpose(w, (2, 3, 1, 0))
        return jax.lax.conv_general_dilated(
            z, wk, window_strides=(1, 1), padding="SAME",
            dimension_numbers=("NHWC", "HWIO", "NHWC"))

    def bn(z, g, b):
        m = jnp.mean(z, axis=(0, 1, 2), keepdims=True)
        v = jnp.mean((z - m) ** 2, axis=(0, 1, 2), keepdims=True)
        return (z - m) * jax.lax.rsqrt(v + BN_EPS) * g + b

    out = conv(x, w1)
    out = jnp.where(out > 0, out, NEG_SLOPE * out)
    out = bn(out, g1, b1)
    out = conv(out, w2)
    out = bn(out, g2, b2)
    out = out + x
    out = jnp.where(out > 0, out, NEG_SLOPE * out)
    return jnp.transpose(out, (0, 3, 1, 2))


if __name__ == "__main__":
    # BasicBlock(inplanes=4, planes=4, stride=1, downsample=None)
    N, C, H, W = 2, 4, 16, 16
    key = jax.random.PRNGKey(0)
    kx, kw1, kw2, kg1, kb1, kg2, kb2 = jax.random.split(key, 7)

    x = jax.random.normal(kx, (N, C, H, W), jnp.float32)
    w1 = jax.random.normal(kw1, (C, C, 3, 3), jnp.float32) * 0.1   # conv1.weight
    w2 = jax.random.normal(kw2, (C, C, 3, 3), jnp.float32) * 0.1   # conv2.weight
    g1 = 1.0 + 0.1 * jax.random.normal(kg1, (C,), jnp.float32)     # bn1.weight
    b1 = 0.1 * jax.random.normal(kb1, (C,), jnp.float32)           # bn1.bias
    g2 = 1.0 + 0.1 * jax.random.normal(kg2, (C,), jnp.float32)     # bn2.weight
    b2 = 0.1 * jax.random.normal(kb2, (C,), jnp.float32)           # bn2.bias

    out = basic_block(x, w1, g1, b1, w2, g2, b2)
    out = jax.block_until_ready(out)

    ref = basic_block_reference(x, w1, g1, b1, w2, g2, b2)
    assert out.shape == (N, C, H, W)
    assert jnp.allclose(out, ref, atol=1e-4, rtol=1e-4), "mismatch vs reference"

    print("KERNEL_OK")
</pallas_src>

<mosaic_0001>
module attributes {stable_mosaic.version = 11 : i64} {
  func.func @kernel(%arg0: memref<2x8x256xf32, #tpu.memory_space<vmem>>, %arg1: memref<8x512xf32, #tpu.memory_space<vmem>>, %arg2: memref<9x8x8xf32, #tpu.memory_space<vmem>>, %arg3: memref<8x1xf32, #tpu.memory_space<vmem>>, %arg4: memref<8x1xf32, #tpu.memory_space<vmem>>, %arg5: memref<9x8x8xf32, #tpu.memory_space<vmem>>, %arg6: memref<8x1xf32, #tpu.memory_space<vmem>>, %arg7: memref<8x1xf32, #tpu.memory_space<vmem>>, %arg8: memref<2x8x256xf32, #tpu.memory_space<vmem>>) attributes {dimension_semantics = [], scalar_prefetch = 0 : i64, scratch_operands = 0 : i64, tpu.core_type = #tpu.core_type<tc>} {
    %c0 = arith.constant 0 : index
    %c0_0 = arith.constant 0 : index
    %0 = vector.load %arg1[%c0, %c0_0] : memref<8x512xf32, #tpu.memory_space<vmem>>, vector<8x512xf32>
    %c0_1 = arith.constant 0 : index
    %c0_2 = arith.constant 0 : index
    %c0_3 = arith.constant 0 : index
    %1 = vector.load %arg0[%c0_1, %c0_2, %c0_3] : memref<2x8x256xf32, #tpu.memory_space<vmem>>, vector<1x8x256xf32>
    %2 = vector.shape_cast %1 : vector<1x8x256xf32> to vector<8x256xf32>
    %c1 = arith.constant 1 : index
    %c0_4 = arith.constant 0 : index
    %c0_5 = arith.constant 0 : index
    %3 = vector.load %arg0[%c1, %c0_4, %c0_5] : memref<2x8x256xf32, #tpu.memory_space<vmem>>, vector<1x8x256xf32>
    %4 = vector.shape_cast %3 : vector<1x8x256xf32> to vector<8x256xf32>
    %5 = tpu.concatenate %2, %4 in 1 : vector<8x256xf32>, vector<8x256xf32> -> vector<8x512xf32>
    %cst = arith.constant 0.000000e+00 : f32
    %6 = vector.broadcast %cst : f32 to vector<8x512xf32>
    %c17_i32 = arith.constant 17 : i32
    %7 = tpu.dynamic_rotate %5 by %c17_i32 dim 1 : vector<8x512xf32>, i32 -> vector<8x512xf32>
    %8 = vector.extract_strided_slice %0 {offsets = [0, 0], sizes = [1, 512], strides = [1, 1]} : vector<8x512xf32> to vector<1x512xf32>
    %9 = vector.broadcast %8 : vector<1x512xf32> to vector<8x512xf32>
    %10 = arith.mulf %7, %9 : vector<8x512xf32>
    %c0_6 = arith.constant 0 : index
    %c0_7 = arith.constant 0 : index
    %c0_8 = arith.constant 0 : index
    %11 = vector.load %arg2[%c0_6, %c0_7, %c0_8] : memref<9x8x8xf32, #tpu.memory_space<vmem>>, vector<1x8x8xf32>
    %12 = vector.shape_cast %11 : vector<1x8x8xf32> to vector<8x8xf32>
    %cst_9 = arith.constant dense<0.000000e+00> : vector<8x512xf32>
    %13 = tpu.matmul %12, %10, %cst_9 {dimension_numbers = #tpu.dot_dimension_numbers<[1], [0], [0], [1], [0, 0, 1, 1], [], []>} : vector<8x8xf32>, vector<8x512xf32>, vector<8x512xf32> -> vector<8x512xf32>
    %14 = arith.addf %6, %13 : vector<8x512xf32>
    %c16_i32 = arith.constant 16 : i32
    %15 = tpu.dynamic_rotate %5 by %c16_i32 dim 1 : vector<8x512xf32>, i32 -> vector<8x512xf32>
    %16 = vector.extract_strided_slice %0 {offsets = [1, 0], sizes = [1, 512], strides = [1, 1]} : vector<8x512xf32> to vector<1x512xf32>
    %17 = vector.broadcast %16 : vector<1x512xf32> to vector<8x512xf32>
    %18 = arith.mulf %15, %17 : vector<8x512xf32>
    %c1_10 = arith.constant 1 : index
    %c0_11 = arith.constant 0 : index
    %c0_12 = arith.constant 0 : index
    %19 = vector.load %arg2[%c1_10, %c0_11, %c0_12] : memref<9x8x8xf32, #tpu.memory_space<vmem>>, vector<1x8x8xf32>
    %20 = vector.shape_cast %19 : vector<1x8x8xf32> to vector<8x8xf32>
    %cst_13 = arith.constant dense<0.000000e+00> : vector<8x512xf32>
    %21 = tpu.matmul %20, %18, %cst_13 {dimension_numbers = #tpu.dot_dimension_numbers<[1], [0], [0], [1], [0, 0, 1, 1], [], []>} : vector<8x8xf32>, vector<8x512xf32>, vector<8x512xf32> -> vector<8x512xf32>
    %22 = arith.addf %14, %21 : vector<8x512xf32>
    %c15_i32 = arith.constant 15 : i32
    %23 = tpu.dynamic_rotate %5 by %c15_i32 dim 1 : vector<8x512xf32>, i32 -> vector<8x512xf32>
    %24 = vector.extract_strided_slice %0 {offsets = [2, 0], sizes = [1, 512], strides = [1, 1]} : vector<8x512xf32> to vector<1x512xf32>
    %25 = vector.broadcast %24 : vector<1x512xf32> to vector<8x512xf32>
    %26 = arith.mulf %23, %25 : vector<8x512xf32>
    %c2 = arith.constant 2 : index
    %c0_14 = arith.constant 0 : index
    %c0_15 = arith.constant 0 : index
    %27 = vector.load %arg2[%c2, %c0_14, %c0_15] : memref<9x8x8xf32, #tpu.memory_space<vmem>>, vector<1x8x8xf32>
    %28 = vector.shape_cast %27 : vector<1x8x8xf32> to vector<8x8xf32>
    %cst_16 = arith.constant dense<0.000000e+00> : vector<8x512xf32>
    %29 = tpu.matmul %28, %26, %cst_16 {dimension_numbers = #tpu.dot_dimension_numbers<[1], [0], [0], [1], [0, 0, 1, 1], [], []>} : vector<8x8xf32>, vector<8x512xf32>, vector<8x512xf32> -> vector<8x512xf32>
    %30 = arith.addf %22, %29 : vector<8x512xf32>
    %c1_i32 = arith.constant 1 : i32
    %31 = tpu.dynamic_rotate %5 by %c1_i32 dim 1 : vector<8x512xf32>, i32 -> vector<8x512xf32>
    %32 = vector.extract_strided_slice %0 {offsets = [3, 0], sizes = [1, 512], strides = [1, 1]} : vector<8x512xf32> to vector<1x512xf32>
    %33 = vector.broadcast %32 : vector<1x512xf32> to vector<8x512xf32>
    %34 = arith.mulf %31, %33 : vector<8x512xf32>
    %c3 = arith.constant 3 : index
    %c0_17 = arith.constant 0 : index
    %c0_18 = arith.constant 0 : index
    %35 = vector.load %arg2[%c3, %c0_17, %c0_18] : memref<9x8x8xf32, #tpu.memory_space<vmem>>, vector<1x8x8xf32>
    %36 = vector.shape_cast %35 : vector<1x8x8xf32> to vector<8x8xf32>
    %cst_19 = arith.constant dense<0.000000e+00> : vector<8x512xf32>
    %37 = tpu.matmul %36, %34, %cst_19 {dimension_numbers = #tpu.dot_dimension_numbers<[1], [0], [0], [1], [0, 0, 1, 1], [], []>} : vector<8x8xf32>, vector<8x512xf32>, vector<8x512xf32> -> vector<8x512xf32>
    %38 = arith.addf %30, %37 : vector<8x512xf32>
    %c4 = arith.constant 4 : index
    %c0_20 = arith.constant 0 : index
    %c0_21 = arith.constant 0 : index
    %39 = vector.load %arg2[%c4, %c0_20, %c0_21] : memref<9x8x8xf32, #tpu.memory_space<vmem>>, vector<1x8x8xf32>
    %40 = vector.shape_cast %39 : vector<1x8x8xf32> to vector<8x8xf32>
    %cst_22 = arith.constant dense<0.000000e+00> : vector<8x512xf32>
    %41 = tpu.matmul %40, %5, %cst_22 {dimension_numbers = #tpu.dot_dimension_numbers<[1], [0], [0], [1], [0, 0, 1, 1], [], []>} : vector<8x8xf32>, vector<8x512xf32>, vector<8x512xf32> -> vector<8x512xf32>
    %42 = arith.addf %38, %41 : vector<8x512xf32>
    %c511_i32 = arith.constant 511 : i32
    %43 = tpu.dynamic_rotate %5 by %c511_i32 dim 1 : vector<8x512xf32>, i32 -> vector<8x512xf32>
    %44 = vector.extract_strided_slice %0 {offsets = [4, 0], sizes = [1, 512], strides = [1, 1]} : vector<8x512xf32> to vector<1x512xf32>
    %45 = vector.broadcast %44 : vector<1x512xf32> to vector<8x512xf32>
    %46 = arith.mulf %43, %45 : vector<8x512xf32>
    %c5 = arith.constant 5 : index
    %c0_23 = arith.constant 0 : index
    %c0_24 = arith.constant 0 : index
    %47 = vector.load %arg2[%c5, %c0_23, %c0_24] : memref<9x8x8xf32, #tpu.memory_space<vmem>>, vector<1x8x8xf32>
    %48 = vector.shape_cast %47 : vector<1x8x8xf32> to vector<8x8xf32>
    %cst_25 = arith.constant dense<0.000000e+00> : vector<8x512xf32>
    %49 = tpu.matmul %48, %46, %cst_25 {dimension_numbers = #tpu.dot_dimension_numbers<[1], [0], [0], [1], [0, 0, 1, 1], [], []>} : vector<8x8xf32>, vector<8x512xf32>, vector<8x512xf32> -> vector<8x512xf32>
    %50 = arith.addf %42, %49 : vector<8x512xf32>
    %c497_i32 = arith.constant 497 : i32
    %51 = tpu.dynamic_rotate %5 by %c497_i32 dim 1 : vector<8x512xf32>, i32 -> vector<8x512xf32>
    %52 = vector.extract_strided_slice %0 {offsets = [5, 0], sizes = [1, 512], strides = [1, 1]} : vector<8x512xf32> to vector<1x512xf32>
    %53 = vector.broadcast %52 : vector<1x512xf32> to vector<8x512xf32>
    %54 = arith.mulf %51, %53 : vector<8x512xf32>
    %c6 = arith.constant 6 : index
    %c0_26 = arith.constant 0 : index
    %c0_27 = arith.constant 0 : index
    %55 = vector.load %arg2[%c6, %c0_26, %c0_27] : memref<9x8x8xf32, #tpu.memory_space<vmem>>, vector<1x8x8xf32>
    %56 = vector.shape_cast %55 : vector<1x8x8xf32> to vector<8x8xf32>
    %cst_28 = arith.constant dense<0.000000e+00> : vector<8x512xf32>
    %57 = tpu.matmul %56, %54, %cst_28 {dimension_numbers = #tpu.dot_dimension_numbers<[1], [0], [0], [1], [0, 0, 1, 1], [], []>} : vector<8x8xf32>, vector<8x512xf32>, vector<8x512xf32> -> vector<8x512xf32>
    %58 = arith.addf %50, %57 : vector<8x512xf32>
    %c496_i32 = arith.constant 496 : i32
    %59 = tpu.dynamic_rotate %5 by %c496_i32 dim 1 : vector<8x512xf32>, i32 -> vector<8x512xf32>
    %60 = vector.extract_strided_slice %0 {offsets = [6, 0], sizes = [1, 512], strides = [1, 1]} : vector<8x512xf32> to vector<1x512xf32>
    %61 = vector.broadcast %60 : vector<1x512xf32> to vector<8x512xf32>
    %62 = arith.mulf %59, %61 : vector<8x512xf32>
    %c7 = arith.constant 7 : index
    %c0_29 = arith.constant 0 : index
    %c0_30 = arith.constant 0 : index
    %63 = vector.load %arg2[%c7, %c0_29, %c0_30] : memref<9x8x8xf32, #tpu.memory_space<vmem>>, vector<1x8x8xf32>
    %64 = vector.shape_cast %63 : vector<1x8x8xf32> to vector<8x8xf32>
    %cst_31 = arith.constant dense<0.000000e+00> : vector<8x512xf32>
    %65 = tpu.matmul %64, %62, %cst_31 {dimension_numbers = #tpu.dot_dimension_numbers<[1], [0], [0], [1], [0, 0, 1, 1], [], []>} : vector<8x8xf32>, vector<8x512xf32>, vector<8x512xf32> -> vector<8x512xf32>
    %66 = arith.addf %58, %65 : vector<8x512xf32>
    %c495_i32 = arith.constant 495 : i32
    %67 = tpu.dynamic_rotate %5 by %c495_i32 dim 1 : vector<8x512xf32>, i32 -> vector<8x512xf32>
    %68 = vector.extract_strided_slice %0 {offsets = [7, 0], sizes = [1, 512], strides = [1, 1]} : vector<8x512xf32> to vector<1x512xf32>
    %69 = vector.broadcast %68 : vector<1x512xf32> to vector<8x512xf32>
    %70 = arith.mulf %67, %69 : vector<8x512xf32>
    %c8 = arith.constant 8 : index
    %c0_32 = arith.constant 0 : index
    %c0_33 = arith.constant 0 : index
    %71 = vector.load %arg2[%c8, %c0_32, %c0_33] : memref<9x8x8xf32, #tpu.memory_space<vmem>>, vector<1x8x8xf32>
    %72 = vector.shape_cast %71 : vector<1x8x8xf32> to vector<8x8xf32>
    %cst_34 = arith.constant dense<0.000000e+00> : vector<8x512xf32>
    %73 = tpu.matmul %72, %70, %cst_34 {dimension_numbers = #tpu.dot_dimension_numbers<[1], [0], [0], [1], [0, 0, 1, 1], [], []>} : vector<8x8xf32>, vector<8x512xf32>, vector<8x512xf32> -> vector<8x512xf32>
    %74 = arith.addf %66, %73 : vector<8x512xf32>
    %cst_35 = arith.constant 0.000000e+00 : f32
    %75 = vector.broadcast %cst_35 : f32 to vector<8x512xf32>
    %76 = arith.cmpf ogt, %74, %75 : vector<8x512xf32>
    %cst_36 = arith.constant 0.00999999977 : f32
    %77 = vector.broadcast %cst_36 : f32 to vector<8x512xf32>
    %78 = arith.mulf %77, %74 : vector<8x512xf32>
    %79 = arith.select %76, %74, %78 : vector<8x512xi1>, vector<8x512xf32>
    %c0_37 = arith.constant 0 : index
    %c0_38 = arith.constant 0 : index
    %80 = vector.load %arg3[%c0_37, %c0_38] : memref<8x1xf32, #tpu.memory_space<vmem>>, vector<8x1xf32>
    %c0_39 = arith.constant 0 : index
    %c0_40 = arith.constant 0 : index
    %81 = vector.load %arg4[%c0_39, %c0_40] : memref<8x1xf32, #tpu.memory_space<vmem>>, vector<8x1xf32>
    %82 = arith.mulf %79, %79 : vector<8x512xf32>
    %83 = tpu.concatenate %79, %82 in 0 : vector<8x512xf32>, vector<8x512xf32> -> vector<16x512xf32>
    %cst_41 = arith.constant dense<0.000000e+00> : vector<16xf32>
    %84 = vector.multi_reduction <add>, %83, %cst_41 [1] : vector<16x512xf32> to vector<16xf32>
    %85 = vector.shape_cast %84 : vector<16xf32> to vector<16x1xf32>
    %86 = vector.extract_strided_slice %85 {offsets = [0, 0], sizes = [8, 1], strides = [1, 1]} : vector<16x1xf32> to vector<8x1xf32>
    %cst_42 = arith.constant 0.001953125 : f32
    %87 = vector.broadcast %cst_42 : f32 to vector<8x1xf32>
    %88 = arith.mulf %86, %87 : vector<8x1xf32>
    %89 = vector.extract_strided_slice %85 {offsets = [8, 0], sizes = [8, 1], strides = [1, 1]} : vector<16x1xf32> to vector<8x1xf32>
    %cst_43 = arith.constant 0.001953125 : f32
    %90 = vector.broadcast %cst_43 : f32 to vector<8x1xf32>
    %91 = arith.mulf %89, %90 : vector<8x1xf32>
    %92 = arith.mulf %88, %88 : vector<8x1xf32>
    %93 = arith.subf %91, %92 : vector<8x1xf32>
    %cst_44 = arith.constant 9.99999974E-6 : f32
    %94 = vector.broadcast %cst_44 : f32 to vector<8x1xf32>
    %95 = arith.addf %93, %94 : vector<8x1xf32>
    %96 = math.rsqrt %95 : vector<8x1xf32>
    %97 = arith.mulf %80, %96 : vector<8x1xf32>
    %98 = arith.mulf %88, %97 : vector<8x1xf32>
    %99 = arith.subf %81, %98 : vector<8x1xf32>
    %100 = vector.broadcast %97 : vector<8x1xf32> to vector<8x512xf32>
    %101 = arith.mulf %79, %100 : vector<8x512xf32>
    %102 = vector.broadcast %99 : vector<8x1xf32> to vector<8x512xf32>
    %103 = arith.addf %101, %102 : vector<8x512xf32>
    %cst_45 = arith.constant 0.000000e+00 : f32
    %104 = vector.broadcast %cst_45 : f32 to vector<8x512xf32>
    %c17_i32_46 = arith.constant 17 : i32
    %105 = tpu.dynamic_rotate %103 by %c17_i32_46 dim 1 : vector<8x512xf32>, i32 -> vector<8x512xf32>
    %106 = vector.extract_strided_slice %0 {offsets = [0, 0], sizes = [1, 512], strides = [1, 1]} : vector<8x512xf32> to vector<1x512xf32>
    %107 = vector.broadcast %106 : vector<1x512xf32> to vector<8x512xf32>
    %108 = arith.mulf %105, %107 : vector<8x512xf32>
    %c0_47 = arith.constant 0 : index
    %c0_48 = arith.constant 0 : index
    %c0_49 = arith.constant 0 : index
    %109 = vector.load %arg5[%c0_47, %c0_48, %c0_49] : memref<9x8x8xf32, #tpu.memory_space<vmem>>, vector<1x8x8xf32>
    %110 = vector.shape_cast %109 : vector<1x8x8xf32> to vector<8x8xf32>
    %cst_50 = arith.constant dense<0.000000e+00> : vector<8x512xf32>
    %111 = tpu.matmul %110, %108, %cst_50 {dimension_numbers = #tpu.dot_dimension_numbers<[1], [0], [0], [1], [0, 0, 1, 1], [], []>} : vector<8x8xf32>, vector<8x512xf32>, vector<8x512xf32> -> vector<8x512xf32>
    %112 = arith.addf %104, %111 : vector<8x512xf32>
    %c16_i32_51 = arith.constant 16 : i32
    %113 = tpu.dynamic_rotate %103 by %c16_i32_51 dim 1 : vector<8x512xf32>, i32 -> vector<8x512xf32>
    %114 = vector.extract_strided_slice %0 {offsets = [1, 0], sizes = [1, 512], strides = [1, 1]} : vector<8x512xf32> to vector<1x512xf32>
    %115 = vector.broadcast %114 : vector<1x512xf32> to vector<8x512xf32>
    %116 = arith.mulf %113, %115 : vector<8x512xf32>
    %c1_52 = arith.constant 1 : index
    %c0_53 = arith.constant 0 : index
    %c0_54 = arith.constant 0 : index
    %117 = vector.load %arg5[%c1_52, %c0_53, %c0_54] : memref<9x8x8xf32, #tpu.memory_space<vmem>>, vector<1x8x8xf32>
    %118 = vector.shape_cast %117 : vector<1x8x8xf32> to vector<8x8xf32>
    %cst_55 = arith.constant dense<0.000000e+00> : vector<8x512xf32>
    %119 = tpu.matmul %118, %116, %cst_55 {dimension_numbers = #tpu.dot_dimension_numbers<[1], [0], [0], [1], [0, 0, 1, 1], [], []>} : vector<8x8xf32>, vector<8x512xf32>, vector<8x512xf32> -> vector<8x512xf32>
    %120 = arith.addf %112, %119 : vector<8x512xf32>
    %c15_i32_56 = arith.constant 15 : i32
    %121 = tpu.dynamic_rotate %103 by %c15_i32_56 dim 1 : vector<8x512xf32>, i32 -> vector<8x512xf32>
    %122 = vector.extract_strided_slice %0 {offsets = [2, 0], sizes = [1, 512], strides = [1, 1]} : vector<8x512xf32> to vector<1x512xf32>
    %123 = vector.broadcast %122 : vector<1x512xf32> to vector<8x512xf32>
    %124 = arith.mulf %121, %123 : vector<8x512xf32>
    %c2_57 = arith.constant 2 : index
    %c0_58 = arith.constant 0 : index
    %c0_59 = arith.constant 0 : index
    %125 = vector.load %arg5[%c2_57, %c0_58, %c0_59] : memref<9x8x8xf32, #tpu.memory_space<vmem>>, vector<1x8x8xf32>
    %126 = vector.shape_cast %125 : vector<1x8x8xf32> to vector<8x8xf32>
    %cst_60 = arith.constant dense<0.000000e+00> : vector<8x512xf32>
    %127 = tpu.matmul %126, %124, %cst_60 {dimension_numbers = #tpu.dot_dimension_numbers<[1], [0], [0], [1], [0, 0, 1, 1], [], []>} : vector<8x8xf32>, vector<8x512xf32>, vector<8x512xf32> -> vector<8x512xf32>
    %128 = arith.addf %120, %127 : vector<8x512xf32>
    %c1_i32_61 = arith.constant 1 : i32
    %129 = tpu.dynamic_rotate %103 by %c1_i32_61 dim 1 : vector<8x512xf32>, i32 -> vector<8x512xf32>
    %130 = vector.extract_strided_slice %0 {offsets = [3, 0], sizes = [1, 512], strides = [1, 1]} : vector<8x512xf32> to vector<1x512xf32>
    %131 = vector.broadcast %130 : vector<1x512xf32> to vector<8x512xf32>
    %132 = arith.mulf %129, %131 : vector<8x512xf32>
    %c3_62 = arith.constant 3 : index
    %c0_63 = arith.constant 0 : index
    %c0_64 = arith.constant 0 : index
    %133 = vector.load %arg5[%c3_62, %c0_63, %c0_64] : memref<9x8x8xf32, #tpu.memory_space<vmem>>, vector<1x8x8xf32>
    %134 = vector.shape_cast %133 : vector<1x8x8xf32> to vector<8x8xf32>
    %cst_65 = arith.constant dense<0.000000e+00> : vector<8x512xf32>
    %135 = tpu.matmul %134, %132, %cst_65 {dimension_numbers = #tpu.dot_dimension_numbers<[1], [0], [0], [1], [0, 0, 1, 1], [], []>} : vector<8x8xf32>, vector<8x512xf32>, vector<8x512xf32> -> vector<8x512xf32>
    %136 = arith.addf %128, %135 : vector<8x512xf32>
    %c4_66 = arith.constant 4 : index
    %c0_67 = arith.constant 0 : index
    %c0_68 = arith.constant 0 : index
    %137 = vector.load %arg5[%c4_66, %c0_67, %c0_68] : memref<9x8x8xf32, #tpu.memory_space<vmem>>, vector<1x8x8xf32>
    %138 = vector.shape_cast %137 : vector<1x8x8xf32> to vector<8x8xf32>
    %cst_69 = arith.constant dense<0.000000e+00> : vector<8x512xf32>
    %139 = tpu.matmul %138, %103, %cst_69 {dimension_numbers = #tpu.dot_dimension_numbers<[1], [0], [0], [1], [0, 0, 1, 1], [], []>} : vector<8x8xf32>, vector<8x512xf32>, vector<8x512xf32> -> vector<8x512xf32>
    %140 = arith.addf %136, %139 : vector<8x512xf32>
    %c511_i32_70 = arith.constant 511 : i32
    %141 = tpu.dynamic_rotate %103 by %c511_i32_70 dim 1 : vector<8x512xf32>, i32 -> vector<8x512xf32>
    %142 = vector.extract_strided_slice %0 {offsets = [4, 0], sizes = [1, 512], strides = [1, 1]} : vector<8x512xf32> to vector<1x512xf32>
    %143 = vector.broadcast %142 : vector<1x512xf32> to vector<8x512xf32>
    %144 = arith.mulf %141, %143 : vector<8x512xf32>
    %c5_71 = arith.constant 5 : index
    %c0_72 = arith.constant 0 : index
    %c0_73 = arith.constant 0 : index
    %145 = vector.load %arg5[%c5_71, %c0_72, %c0_73] : memref<9x8x8xf32, #tpu.memory_space<vmem>>, vector<1x8x8xf32>
    %146 = vector.shape_cast %145 : vector<1x8x8xf32> to vector<8x8xf32>
    %cst_74 = arith.constant dense<0.000000e+00> : vector<8x512xf32>
    %147 = tpu.matmul %146, %144, %cst_74 {dimension_numbers = #tpu.dot_dimension_numbers<[1], [0], [0], [1], [0, 0, 1, 1], [], []>} : vector<8x8xf32>, vector<8x512xf32>, vector<8x512xf32> -> vector<8x512xf32>
    %148 = arith.addf %140, %147 : vector<8x512xf32>
    %c497_i32_75 = arith.constant 497 : i32
    %149 = tpu.dynamic_rotate %103 by %c497_i32_75 dim 1 : vector<8x512xf32>, i32 -> vector<8x512xf32>
    %150 = vector.extract_strided_slice %0 {offsets = [5, 0], sizes = [1, 512], strides = [1, 1]} : vector<8x512xf32> to vector<1x512xf32>
    %151 = vector.broadcast %150 : vector<1x512xf32> to vector<8x512xf32>
    %152 = arith.mulf %149, %151 : vector<8x512xf32>
    %c6_76 = arith.constant 6 : index
    %c0_77 = arith.constant 0 : index
    %c0_78 = arith.constant 0 : index
    %153 = vector.load %arg5[%c6_76, %c0_77, %c0_78] : memref<9x8x8xf32, #tpu.memory_space<vmem>>, vector<1x8x8xf32>
    %154 = vector.shape_cast %153 : vector<1x8x8xf32> to vector<8x8xf32>
    %cst_79 = arith.constant dense<0.000000e+00> : vector<8x512xf32>
    %155 = tpu.matmul %154, %152, %cst_79 {dimension_numbers = #tpu.dot_dimension_numbers<[1], [0], [0], [1], [0, 0, 1, 1], [], []>} : vector<8x8xf32>, vector<8x512xf32>, vector<8x512xf32> -> vector<8x512xf32>
    %156 = arith.addf %148, %155 : vector<8x512xf32>
    %c496_i32_80 = arith.constant 496 : i32
    %157 = tpu.dynamic_rotate %103 by %c496_i32_80 dim 1 : vector<8x512xf32>, i32 -> vector<8x512xf32>
    %158 = vector.extract_strided_slice %0 {offsets = [6, 0], sizes = [1, 512], strides = [1, 1]} : vector<8x512xf32> to vector<1x512xf32>
    %159 = vector.broadcast %158 : vector<1x512xf32> to vector<8x512xf32>
    %160 = arith.mulf %157, %159 : vector<8x512xf32>
    %c7_81 = arith.constant 7 : index
    %c0_82 = arith.constant 0 : index
    %c0_83 = arith.constant 0 : index
    %161 = vector.load %arg5[%c7_81, %c0_82, %c0_83] : memref<9x8x8xf32, #tpu.memory_space<vmem>>, vector<1x8x8xf32>
    %162 = vector.shape_cast %161 : vector<1x8x8xf32> to vector<8x8xf32>
    %cst_84 = arith.constant dense<0.000000e+00> : vector<8x512xf32>
    %163 = tpu.matmul %162, %160, %cst_84 {dimension_numbers = #tpu.dot_dimension_numbers<[1], [0], [0], [1], [0, 0, 1, 1], [], []>} : vector<8x8xf32>, vector<8x512xf32>, vector<8x512xf32> -> vector<8x512xf32>
    %164 = arith.addf %156, %163 : vector<8x512xf32>
    %c495_i32_85 = arith.constant 495 : i32
    %165 = tpu.dynamic_rotate %103 by %c495_i32_85 dim 1 : vector<8x512xf32>, i32 -> vector<8x512xf32>
    %166 = vector.extract_strided_slice %0 {offsets = [7, 0], sizes = [1, 512], strides = [1, 1]} : vector<8x512xf32> to vector<1x512xf32>
    %167 = vector.broadcast %166 : vector<1x512xf32> to vector<8x512xf32>
    %168 = arith.mulf %165, %167 : vector<8x512xf32>
    %c8_86 = arith.constant 8 : index
    %c0_87 = arith.constant 0 : index
    %c0_88 = arith.constant 0 : index
    %169 = vector.load %arg5[%c8_86, %c0_87, %c0_88] : memref<9x8x8xf32, #tpu.memory_space<vmem>>, vector<1x8x8xf32>
    %170 = vector.shape_cast %169 : vector<1x8x8xf32> to vector<8x8xf32>
    %cst_89 = arith.constant dense<0.000000e+00> : vector<8x512xf32>
    %171 = tpu.matmul %170, %168, %cst_89 {dimension_numbers = #tpu.dot_dimension_numbers<[1], [0], [0], [1], [0, 0, 1, 1], [], []>} : vector<8x8xf32>, vector<8x512xf32>, vector<8x512xf32> -> vector<8x512xf32>
    %172 = arith.addf %164, %171 : vector<8x512xf32>
    %c0_90 = arith.constant 0 : index
    %c0_91 = arith.constant 0 : index
    %173 = vector.load %arg6[%c0_90, %c0_91] : memref<8x1xf32, #tpu.memory_space<vmem>>, vector<8x1xf32>
    %c0_92 = arith.constant 0 : index
    %c0_93 = arith.constant 0 : index
    %174 = vector.load %arg7[%c0_92, %c0_93] : memref<8x1xf32, #tpu.memory_space<vmem>>, vector<8x1xf32>
    %175 = arith.mulf %172, %172 : vector<8x512xf32>
    %176 = tpu.concatenate %172, %175 in 0 : vector<8x512xf32>, vector<8x512xf32> -> vector<16x512xf32>
    %cst_94 = arith.constant dense<0.000000e+00> : vector<16xf32>
    %177 = vector.multi_reduction <add>, %176, %cst_94 [1] : vector<16x512xf32> to vector<16xf32>
    %178 = vector.shape_cast %177 : vector<16xf32> to vector<16x1xf32>
    %179 = vector.extract_strided_slice %178 {offsets = [0, 0], sizes = [8, 1], strides = [1, 1]} : vector<16x1xf32> to vector<8x1xf32>
    %cst_95 = arith.constant 0.001953125 : f32
    %180 = vector.broadcast %cst_95 : f32 to vector<8x1xf32>
    %181 = arith.mulf %179, %180 : vector<8x1xf32>
    %182 = vector.extract_strided_slice %178 {offsets = [8, 0], sizes = [8, 1], strides = [1, 1]} : vector<16x1xf32> to vector<8x1xf32>
    %cst_96 = arith.constant 0.001953125 : f32
    %183 = vector.broadcast %cst_96 : f32 to vector<8x1xf32>
    %184 = arith.mulf %182, %183 : vector<8x1xf32>
    %185 = arith.mulf %181, %181 : vector<8x1xf32>
    %186 = arith.subf %184, %185 : vector<8x1xf32>
    %cst_97 = arith.constant 9.99999974E-6 : f32
    %187 = vector.broadcast %cst_97 : f32 to vector<8x1xf32>
    %188 = arith.addf %186, %187 : vector<8x1xf32>
    %189 = math.rsqrt %188 : vector<8x1xf32>
    %190 = arith.mulf %173, %189 : vector<8x1xf32>
    %191 = arith.mulf %181, %190 : vector<8x1xf32>
    %192 = arith.subf %174, %191 : vector<8x1xf32>
    %193 = vector.broadcast %190 : vector<8x1xf32> to vector<8x512xf32>
    %194 = arith.mulf %172, %193 : vector<8x512xf32>
    %195 = vector.broadcast %192 : vector<8x1xf32> to vector<8x512xf32>
    %196 = arith.addf %194, %195 : vector<8x512xf32>
    %197 = arith.addf %196, %5 : vector<8x512xf32>
    %cst_98 = arith.constant 0.000000e+00 : f32
    %198 = vector.broadcast %cst_98 : f32 to vector<8x512xf32>
    %199 = arith.cmpf ogt, %197, %198 : vector<8x512xf32>
    %cst_99 = arith.constant 0.00999999977 : f32
    %200 = vector.broadcast %cst_99 : f32 to vector<8x512xf32>
    %201 = arith.mulf %200, %197 : vector<8x512xf32>
    %202 = arith.select %199, %197, %201 : vector<8x512xi1>, vector<8x512xf32>
    %203 = vector.extract_strided_slice %202 {offsets = [0, 0], sizes = [8, 256], strides = [1, 1]} : vector<8x512xf32> to vector<8x256xf32>
    %c0_100 = arith.constant 0 : index
    %c0_101 = arith.constant 0 : index
    %c0_102 = arith.constant 0 : index
    %204 = vector.load %arg8[%c0_100, %c0_101, %c0_102] : memref<2x8x256xf32, #tpu.memory_space<vmem>>, vector<1x8x256xf32>
    %205 = vector.shape_cast %204 : vector<1x8x256xf32> to vector<8x256xf32>
    %206 = vector.shape_cast %203 : vector<8x256xf32> to vector<1x8x256xf32>
    tpu.vector_store %arg8[%c0_100, %c0_101, %c0_102], %206 {strides = array<i32>} : memref<2x8x256xf32, #tpu.memory_space<vmem>>, vector<1x8x256xf32>,
    %207 = vector.extract_strided_slice %202 {offsets = [0, 256], sizes = [8, 256], strides = [1, 1]} : vector<8x512xf32> to vector<8x256xf32>
    %c1_103 = arith.constant 1 : index
    %c0_104 = arith.constant 0 : index
    %c0_105 = arith.constant 0 : index
    %208 = vector.load %arg8[%c1_103, %c0_104, %c0_105] : memref<2x8x256xf32, #tpu.memory_space<vmem>>, vector<1x8x256xf32>
    %209 = vector.shape_cast %208 : vector<1x8x256xf32> to vector<8x256xf32>
    %210 = vector.shape_cast %207 : vector<8x256xf32> to vector<1x8x256xf32>
    tpu.vector_store %arg8[%c1_103, %c0_104, %c0_105], %210 {strides = array<i32>} : memref<2x8x256xf32, #tpu.memory_space<vmem>>, vector<1x8x256xf32>,
    return
  }
}

</mosaic_0001>

<bundles_post_ra>
// kernel: tpu_custom_call.1
= control target key start
LH: loop header
LB: loop body
LE: loop exit
PB: predicated region body
PF: predicated region fallthrough
CT: control target
= control target key end

     0   :  { %s2214_s9 = smov 16   ;;  %s2926_s0 = inlined_call_operand.vmem [shape: f32[2,8,256], index: 0, kind: input, shape index: {}]   ;;  %s2927_s1 = inlined_call_operand.vmem [shape: f32[8,512], index: 1, kind: input, shape index: {}]   ;;  %s2928_s2 = inlined_call_operand.vmem [shape: f32[9,8,8], index: 2, kind: input, shape index: {}]   ;;  %s2929_s3 = inlined_call_operand.vmem [shape: f32[8,1], index: 3, kind: input, shape index: {}]   ;;  %s2930_s4 = inlined_call_operand.vmem [shape: f32[8,1], index: 4, kind: input, shape index: {}]   ;;  %s2931_s5 = inlined_call_operand.vmem [shape: f32[9,8,8], index: 5, kind: input, shape index: {}]   ;;  %s2932_s6 = inlined_call_operand.vmem [shape: f32[8,1], index: 6, kind: input, shape index: {}]   ;;  %s2933_s7 = inlined_call_operand.vmem [shape: f32[8,1], index: 7, kind: input, shape index: {}]   ;;  %s2934_s8 = inlined_call_operand.hbm [shape: f32[2,8,256], index: 8, kind: output, shape index: {}]  }
   0x1   :  { %v2273_v0 = vld [vmem:[%s2926_s0 + $0x18] sm:$0xff]  ;;  %v2278_v1 = vld [vmem:[%s2926_s0 + $0x8] sm:$0xff] }
   0x2   :  { %69 = vrot.lane.b32.xlu1 %v2273_v0, %s2214_s9  ;;  %65 = vrot.lane.b32.xlu0 %v2278_v1, %s2214_s9 }
   0x3   :  { %13 = vsyncpa [#allocation3], 0  ;;  %s2215_s10 = smov 17   ;;  %v2289_v2 = vld [vmem:[%s2926_s0 + $0x10] sm:$0xff]  ;;  %v2294_v3 = vld [vmem:[%s2926_s0] sm:$0xff]  ;;  %s2216_s15 = smov 15   ;;  %v47_v7 = vlaneseq }
   0x4   :  { %41 = vrot.lane.b32.xlu2 %v2278_v1, %s2215_s10  ;;  %s2217_s16 = smov 1   ;;  %s2218_s17 = smov 127   ;;  %v2361_v11 = vld [vmem:[%s2927_s1] sm:$0xff]  ;;  %v2366_v12 = vld [vmem:[%s2927_s1 + $0x8] sm:$0xff]  ;;  %v2371_v13 = vld [vmem:[%s2927_s1 + $0x18] sm:$0xff]  ;;  %vm86_vm2 = vcmask 64512  }
   0x5   :  { %s2219_s18 = smov 113   ;;  %s2220_s19 = smov 112   ;;  %v2356_v10 = vand.u32 127, %v47_v7  ;;  %v2377_v14 = vld [vmem:[%s2927_s1 + $0x10] sm:$0xff]  ;;  %v76_v16 = vperm.slane %v2361_v11, 1  ;;  %v77_v17 = vperm.slane %v2366_v12, 1 }
   0x6   :  { %s2221_s20 = smov 111   ;;  %v78_v18 = vperm.slane %v2377_v14, 1  ;;  %v79_v19 = vperm.slane %v2371_v13, 1  ;;  %v56_v22 = vperm.slane %v2377_v14, 0  ;;  %v2079_v32 = vld [vmem:[%s2928_s2 + $0x8] sm:$0xff]  ;;  %v54_v33 = vperm.slane %v2361_v11, 0 }
   0x7   :  { %vm71_vm0 = vcmp.lt.s32.totalorder %v2356_v10, 16  ;;  %vm49_vm1 = vcmp.lt.s32.totalorder %v2356_v10, 17  ;;  %vm261_vm3 = vcmp.lt.s32.totalorder %v2356_v10, 15  ;;  %v267_v34 = vperm.slane %v2366_v12, 2  ;;  %v62_v49 = vld [vmem:[%s2928_s2] sm:$0xff]  ;;  %v2088_v62 = vld [vmem:[%s2928_s2 + $0x10] sm:$0xff] }
   0x8   :  { %v55_v36 = vperm.slane %v2366_v12, 0  ;;  %v57_v37 = vperm.slane %v2371_v13, 0  ;;  %v268_v50 = vperm.slane %v2377_v14, 2  ;;  %v266_v51 = vperm.slane %v2361_v11, 2 }
   0x9   :  { %v2954_v52 = vperm.slane %v2371_v13, 2  ;;  %vm371_vm4 = vcmp.lt.s32.totalorder %v2356_v10, 1  ;;  %v2952_v63 = vperm.slane %v2377_v14, 3  ;;  %vm570_vm5 = vcmp.lt.s32.totalorder %v2356_v10, 127 }
   0xa   :  { %67 = vrot.lane.b32.xlu0 %v2289_v2, %s2214_s9  ;;  %63 = vrot.lane.b32.xlu1 %v2294_v3, %s2214_s9  ;;  %vm680_vm6 = vcmp.lt.s32.totalorder %v2356_v10, 113  ;;  %vm790_vm7 = vcmp.lt.s32.totalorder %v2356_v10, 112  ;;  %vm900_vm8 = vcmp.lt.s32.totalorder %v2356_v10, 111 }
   0xc   :  { %43 = vrot.lane.b32.xlu2 %v2289_v2, %s2215_s10 }
  0x12   :  { %45 = vrot.lane.b32.xlu0 %v2273_v0, %s2215_s10  ;;  %39 = vrot.lane.b32.xlu1 %v2294_v3, %s2215_s10 }
  0x14   :  { %255 = vrot.lane.b32.xlu2 %v2278_v1, %s2216_s15 }
  0x1a   :  { %257 = vrot.lane.b32.xlu0 %v2289_v2, %s2216_s15  ;;  %259 = vrot.lane.b32.xlu1 %v2273_v0, %s2216_s15 }
  0x1c   :  { %253 = vrot.lane.b32.xlu2 %v2294_v3, %s2216_s15 }
  0x22   :  { %365 = vrot.lane.b32.xlu0 %v2278_v1, %s2217_s16  ;;  %367 = vrot.lane.b32.xlu1 %v2289_v2, %s2217_s16 }
  0x24   :  { %369 = vrot.lane.b32.xlu2 %v2273_v0, %s2217_s16 }
  0x2a   :  { %363 = vrot.lane.b32.xlu0 %v2294_v3, %s2217_s16  ;;  %566 = vrot.lane.b32.xlu1 %v2289_v2, %s2218_s17 }
  0x2c   :  { %568 = vrot.lane.b32.xlu2 %v2273_v0, %s2218_s17 }
  0x32   :  { %562 = vrot.lane.b32.xlu0 %v2294_v3, %s2218_s17  ;;  %564 = vrot.lane.b32.xlu1 %v2278_v1, %s2218_s17 }
  0x34   :  { %676 = vrot.lane.b32.xlu2 %v2289_v2, %s2219_s18 }
  0x3a   :  { %678 = vrot.lane.b32.xlu0 %v2273_v0, %s2219_s18  ;;  %672 = vrot.lane.b32.xlu1 %v2294_v3, %s2219_s18 }
  0x3c   :  { %674 = vrot.lane.b32.xlu2 %v2278_v1, %s2219_s18 }
  0x42   :  { %786 = vrot.lane.b32.xlu0 %v2289_v2, %s2220_s19  ;;  %788 = vrot.lane.b32.xlu1 %v2273_v0, %s2220_s19 }
  0x44   :  { %782 = vrot.lane.b32.xlu2 %v2294_v3, %s2220_s19 }
  0x4a   :  { %784 = vrot.lane.b32.xlu0 %v2278_v1, %s2220_s19  ;;  %896 = vrot.lane.b32.xlu1 %v2289_v2, %s2221_s20 }
  0x4c   :  { %898 = vrot.lane.b32.xlu2 %v2273_v0, %s2221_s20 }
  0x52   :  { %892 = vrot.lane.b32.xlu0 %v2294_v3, %s2221_s20  ;;  %894 = vrot.lane.b32.xlu1 %v2278_v1, %s2221_s20 }
  0x5e   :  { %v42_v4 = vpop.permute.xlu2 %41 }
  0x66   :  { %v44_v5 = vpop.permute.xlu2 %43 }
  0x67   :  { %v51_v31 = vsel %vm49_vm1, %v42_v4, %v44_v5 }
  0x68   :  { %v60_v35 = vmul.f32 %v56_v22, %v51_v31 }
  0x6e   :  { %v2354_v6 = vpop.permute.xlu2 %255 }
  0x74   :  { %v70_v8 = vpop.permute.xlu1 %69  ;;  %v66_v9 = vpop.permute.xlu0 %65 }
  0x76   :  { %v2379_v15 = vpop.permute.xlu2 %253 }
  0x77   :  { %v264_v38 = vsel %vm261_vm3, %v2379_v15, %v2354_v6 }
  0x78   :  { %v271_v45 = vmul.f32 %v267_v34, %v264_v38  ;;  %v2947_v38 = vperm.slane %v2361_v11, 4 }
  0x7c   :  { %v68_v20 = vpop.permute.xlu0 %67  ;;  %v64_v21 = vpop.permute.xlu1 %63 }
  0x7d   :  { %v75_v23 = vsel %vm71_vm0, %v70_v8, %v64_v21  ;;  %v74_v24 = vsel %vm71_vm0, %v64_v21, %v66_v9  ;;  %v73_v25 = vsel %vm71_vm0, %v66_v9, %v68_v20  ;;  %v72_v26 = vsel %vm71_vm0, %v68_v20, %v70_v8  ;;  %v2093_v20 = vld [vmem:[%s2928_s2 + $0x18] sm:$0xff] }
  0x7e   :  { %v80_v27 = vmul.f32 %v76_v16, %v75_v23  ;;  %v81_v28 = vmul.f32 %v77_v17, %v74_v24  ;;  %v82_v29 = vmul.f32 %v78_v18, %v73_v25  ;;  %v83_v30 = vmul.f32 %v79_v19, %v72_v26  ;;  %v2423_v39 = vpop.permute.xlu2 %369 }
  0x7f   :  { %v2953_v23 = vperm.slane %v2361_v11, 3  ;;  %v377_v24 = vperm.slane %v2366_v12, 3  ;;  %v2949_v25 = vperm.slane %v2377_v14, 4 }
  0x80   :  { %105 = vmatpush.msra.mxu0 %v80_v27  ;;  %125 = vmatpush.msra.mxu1 %v81_v28 }
  0x81   :  { %145 = vmatpush.msra.mxu2 %v82_v29  ;;  %165 = vmatpush.msra.mxu3 %v83_v30 }
  0x82   :  { %2080 = vmatmul.msk.f32.vlgmr.msra.gmra.mxu0 %vm86_vm2, %v2079_v32  ;;  %2081 = vmatmul.msk.f32.vlgmr.msra.gmra.mxu1 %vm86_vm2, %v2079_v32 }
  0x83   :  { %2082 = vmatmul.msk.f32.vlgmr.msra.gmra.mxu2 %vm86_vm2, %v2079_v32  ;;  %2083 = vmatmul.msk.f32.vlgmr.msra.gmra.mxu3 %vm86_vm2, %v2079_v32  ;;  %v2098_v32 = vld [vmem:[%s2928_s2 + $0x20] sm:$0xff] }
  0x84   :  { %228 = vmatpush.msrb.mxu2 %v60_v35  ;;  %v46_v40 = vpop.permute.xlu0 %45  ;;  %v40_v41 = vpop.permute.xlu1 %39  ;;  %v2950_v35 = vperm.slane %v2371_v13, 4 }
  0x85   :  { %v50_v42 = vsel %vm49_vm1, %v44_v5, %v46_v40  ;;  %v52_v43 = vsel %vm49_vm1, %v40_v41, %v42_v4  ;;  %v53_v44 = vsel %vm49_vm1, %v46_v40, %v40_v41  ;;  %v2951_v4 = vperm.slane %v2371_v13, 3 }
  0x86   :  { %v58_v46 = vmul.f32 %v54_v33, %v53_v44  ;;  %v59_v47 = vmul.f32 %v55_v36, %v52_v43  ;;  %v61_v48 = vmul.f32 %v57_v37, %v50_v42  ;;  %v569_v61 = vpop.permute.xlu2 %568  ;;  %v2945_v43 = vperm.slane %v2366_v12, 5 }
  0x88   :  { %188 = vmatpush.msrb.mxu0 %v58_v46  ;;  %208 = vmatpush.msrb.mxu1 %v59_v47 }
  0x89   :  { %248 = vmatpush.msrb.mxu3 %v61_v48 }
  0x8a   :  { %314 = vmatpush.msra.mxu1 %v271_v45  ;;  %2084 = vmatmul.msk.f32.vlgmr.msrb.gmra.mxu0 %vm86_vm2, %v62_v49 }
  0x8b   :  { %2085 = vmatmul.msk.f32.vlgmr.msrb.gmra.mxu1 %vm86_vm2, %v62_v49  ;;  %2086 = vmatmul.msk.f32.vlgmr.msrb.gmra.mxu2 %vm86_vm2, %v62_v49 }
  0x8c   :  { %2087 = vmatmul.msk.f32.vlgmr.msrb.gmra.mxu3 %vm86_vm2, %v62_v49  ;;  %v258_v53 = vpop.permute.xlu0 %257  ;;  %v260_v54 = vpop.permute.xlu1 %259  ;;  %v2103_v49 = vld [vmem:[%s2928_s2 + $0x28] sm:$0xff] }
  0x8d   :  { %v263_v55 = vsel %vm261_vm3, %v2354_v6, %v258_v53  ;;  %v262_v56 = vsel %vm261_vm3, %v258_v53, %v260_v54  ;;  %v265_v57 = vsel %vm261_vm3, %v260_v54, %v2379_v15  ;;  %v2948_v54 = vperm.slane %v2377_v14, 5 }
  0x8e   :  { %v272_v58 = vmul.f32 %v268_v50, %v263_v55  ;;  %v270_v59 = vmul.f32 %v266_v51, %v265_v57  ;;  %v273_v60 = vmul.f32 %v2954_v52, %v262_v56  ;;  %v677_v21 = vpop.permute.xlu2 %676  ;;  %v2943_v55 = vperm.slane %v2361_v11, 5 }
  0x8f   :  { %v2942_v56 = vperm.slane %v2371_v13, 5 }
  0x90   :  { %294 = vmatpush.msra.mxu0 %v270_v59  ;;  %334 = vmatpush.msra.mxu2 %v272_v58 }
  0x91   :  { %354 = vmatpush.msra.mxu3 %v273_v60 }
  0x92   :  { %2089 = vmatmul.msk.f32.vlgmr.msra.gmra.mxu0 %vm86_vm2, %v2088_v62 }
  0x93   :  { %2090 = vmatmul.msk.f32.vlgmr.msra.gmra.mxu1 %vm86_vm2, %v2088_v62  ;;  %2091 = vmatmul.msk.f32.vlgmr.msra.gmra.mxu2 %vm86_vm2, %v2088_v62 }
  0x94   :  { %2092 = vmatmul.msk.f32.vlgmr.msra.gmra.mxu3 %vm86_vm2, %v2088_v62  ;;  %v366_v5 = vpop.permute.xlu0 %365  ;;  %v368_v6 = vpop.permute.xlu1 %367 }
  0x95   :  { %v372_v7 = vsel %vm371_vm4, %v368_v6, %v2423_v39  ;;  %v373_v8 = vsel %vm371_vm4, %v366_v5, %v368_v6 }
  0x96   :  { %v382_v9 = vmul.f32 %v2952_v63, %v373_v8  ;;  %v383_v15 = vmul.f32 %v2951_v4, %v372_v7  ;;  %v675_v40 = vpop.permute.xlu2 %674  ;;  %v2108_v7 = vld [vmem:[%s2928_s2 + $0x30] sm:$0xff] }
  0x97   :  { %v682_v46 = vsel %vm680_vm6, %v675_v40, %v677_v21 }
  0x98   :  { %444 = vmatpush.msrb.mxu2 %v382_v9  ;;  %464 = vmatpush.msrb.mxu3 %v383_v15  ;;  %v690_v53 = vmul.f32 %v2945_v43, %v682_v46  ;;  %v2940_v9 = vperm.slane %v2377_v14, 6  ;;  %v2939_v15 = vperm.slane %v2371_v13, 6 }
  0x9a   :  { %533 = vmatpush.msra.mxu2 %v2289_v2  ;;  %553 = vmatpush.msra.mxu3 %v2273_v0 }
  0x9b   :  { %2096 = vmatmul.msk.f32.vlgmr.msrb.gmra.mxu2 %vm86_vm2, %v2093_v20 }
  0x9c   :  { %2097 = vmatmul.msk.f32.vlgmr.msrb.gmra.mxu3 %vm86_vm2, %v2093_v20  ;;  %v364_v26 = vpop.permute.xlu0 %363  ;;  %v567_v27 = vpop.permute.xlu1 %566 }
  0x9d   :  { %v374_v28 = vsel %vm371_vm4, %v364_v26, %v366_v5  ;;  %v375_v0 = vsel %vm371_vm4, %v2423_v39, %v364_v26  ;;  %v571_v2 = vsel %vm570_vm5, %v567_v27, %v569_v61  ;;  %v2946_v39 = vperm.slane %v2366_v12, 4 }
  0x9e   :  { %v380_v29 = vmul.f32 %v2953_v23, %v375_v0  ;;  %v381_v30 = vmul.f32 %v377_v24, %v374_v28  ;;  %v581_v31 = vmul.f32 %v2949_v25, %v571_v2  ;;  %v783_v8 = vpop.permute.xlu2 %782  ;;  %v2113_v2 = vld [vmem:[%s2928_s2 + $0x38] sm:$0xff] }
  0xa0   :  { %404 = vmatpush.msrb.mxu0 %v380_v29  ;;  %424 = vmatpush.msrb.mxu1 %v381_v30  ;;  %v2941_v29 = vperm.slane %v2361_v11, 6  ;;  %v2944_v30 = vperm.slane %v2366_v12, 6 }
  0xa1   :  { %2094 = vmatmul.msk.f32.vlgmr.msrb.gmra.mxu0 %vm86_vm2, %v2093_v20  ;;  %2095 = vmatmul.msk.f32.vlgmr.msrb.gmra.mxu1 %vm86_vm2, %v2093_v20 }
  0xa2   :  { %643 = vmatpush.msrb.mxu2 %v581_v31  ;;  %493 = vmatpush.msra.mxu0 %v2294_v3 }
  0xa3   :  { %2101 = vmatmul.msk.f32.vlgmr.msra.gmra.mxu2 %vm86_vm2, %v2098_v32  ;;  %513 = vmatpush.msra.mxu1 %v2278_v1 }
  0xa4   :  { %2102 = vmatmul.msk.f32.vlgmr.msra.gmra.mxu3 %vm86_vm2, %v2098_v32  ;;  %v563_v41 = vpop.permute.xlu0 %562  ;;  %v565_v42 = vpop.permute.xlu1 %564 }
  0xa5   :  { %v574_v44 = vsel %vm570_vm5, %v569_v61, %v563_v41  ;;  %v572_v45 = vsel %vm570_vm5, %v565_v42, %v567_v27  ;;  %v573_v3 = vsel %vm570_vm5, %v563_v41, %v565_v42 }
  0xa6   :  { %v582_v47 = vmul.f32 %v2950_v35, %v574_v44  ;;  %v579_v1 = vmul.f32 %v2947_v38, %v573_v3  ;;  %v580_v48 = vmul.f32 %v2946_v39, %v572_v45  ;;  %v899_v31 = vpop.permute.xlu2 %898 }
  0xa8   :  { %603 = vmatpush.msrb.mxu0 %v579_v1  ;;  %623 = vmatpush.msrb.mxu1 %v580_v48  ;;  %v2118_v1 = vld [vmem:[%s2928_s2 + $0x40] sm:$0xff]  ;;  %v2938_v48 = vperm.slane %v2371_v13, 7 }
  0xa9   :  { %663 = vmatpush.msrb.mxu3 %v582_v47  ;;  %2099 = vmatmul.msk.f32.vlgmr.msra.gmra.mxu0 %vm86_vm2, %v2098_v32 }
  0xaa   :  { %2100 = vmatmul.msk.f32.vlgmr.msra.gmra.mxu1 %vm86_vm2, %v2098_v32  ;;  %v2937_v32 = vperm.slane %v2377_v14, 7 }
  0xab   :  { %2106 = vmatmul.msk.f32.vlgmr.msrb.gmra.mxu2 %vm86_vm2, %v2103_v49  ;;  %733 = vmatpush.msra.mxu1 %v690_v53  ;;  %v2935_v53 = vperm.slane %v2366_v12, 7 }
  0xac   :  { %2107 = vmatmul.msk.f32.vlgmr.msrb.gmra.mxu3 %vm86_vm2, %v2103_v49  ;;  %v679_v57 = vpop.permute.xlu0 %678  ;;  %v673_v58 = vpop.permute.xlu1 %672 }
  0xad   :  { %v681_v59 = vsel %vm680_vm6, %v677_v21, %v679_v57  ;;  %v683_v60 = vsel %vm680_vm6, %v673_v58, %v675_v40  ;;  %v684_v61 = vsel %vm680_vm6, %v679_v57, %v673_v58 }
  0xae   :  { %v691_v62 = vmul.f32 %v2948_v54, %v681_v59  ;;  %v689_v5 = vmul.f32 %v2943_v55, %v683_v60  ;;  %v692_v6 = vmul.f32 %v2942_v56, %v684_v61 }
  0xb0   :  { %753 = vmatpush.msra.mxu2 %v691_v62  ;;  %773 = vmatpush.msra.mxu3 %v692_v6 }
  0xb1   :  { %2104 = vmatmul.msk.f32.vlgmr.msrb.gmra.mxu0 %vm86_vm2, %v2103_v49 }
  0xb2   :  { %2105 = vmatmul.msk.f32.vlgmr.msrb.gmra.mxu1 %vm86_vm2, %v2103_v49  ;;  %713 = vmatpush.msra.mxu0 %v689_v5  ;;  %v2936_v49 = vperm.slane %v2361_v11, 7 }
  0xb3   :  { %2111 = vmatmul.msk.f32.vlgmr.msra.gmra.mxu2 %vm86_vm2, %v2108_v7 }
  0xb4   :  { %2112 = vmatmul.msk.f32.vlgmr.msra.gmra.mxu3 %vm86_vm2, %v2108_v7  ;;  %v787_v20 = vpop.permute.xlu0 %786  ;;  %v789_v21 = vpop.permute.xlu1 %788 }
  0xb5   :  { %v791_v26 = vsel %vm790_vm7, %v787_v20, %v789_v21  ;;  %v794_v27 = vsel %vm790_vm7, %v789_v21, %v783_v8 }
  0xb6   :  { %v801_v28 = vmul.f32 %v2940_v9, %v791_v26  ;;  %v802_v0 = vmul.f32 %v2939_v15, %v794_v27 }
  0xb8   :  { %863 = vmatpush.msrb.mxu2 %v801_v28  ;;  %883 = vmatpush.msrb.mxu3 %v802_v0 }
  0xb9   :  { %2109 = vmatmul.msk.f32.vlgmr.msra.gmra.mxu0 %vm86_vm2, %v2108_v7 }
  0xba   :  { %2110 = vmatmul.msk.f32.vlgmr.msra.gmra.mxu1 %vm86_vm2, %v2108_v7 }
  0xbb   :  { %2116 = vmatmul.msk.f32.vlgmr.msrb.gmra.mxu2 %vm86_vm2, %v2113_v2 }
  0xbc   :  { %2117 = vmatmul.msk.f32.vlgmr.msrb.gmra.mxu3 %vm86_vm2, %v2113_v2  ;;  %v785_v40 = vpop.permute.xlu0 %784  ;;  %v897_v41 = vpop.permute.xlu1 %896 }
  0xbd   :  { %v792_v42 = vsel %vm790_vm7, %v785_v40, %v787_v20  ;;  %v793_v44 = vsel %vm790_vm7, %v783_v8, %v785_v40  ;;  %v901_v45 = vsel %vm900_vm8, %v897_v41, %v899_v31 }
  0xbe   :  { %v799_v3 = vmul.f32 %v2941_v29, %v793_v44  ;;  %v800_v46 = vmul.f32 %v2944_v30, %v792_v42  ;;  %v911_v47 = vmul.f32 %v2937_v32, %v901_v45 }
  0xc0   :  { %823 = vmatpush.msrb.mxu0 %v799_v3  ;;  %843 = vmatpush.msrb.mxu1 %v800_v46 }
  0xc1   :  { %973 = vmatpush.msra.mxu2 %v911_v47  ;;  %2114 = vmatmul.msk.f32.vlgmr.msrb.gmra.mxu0 %vm86_vm2, %v2113_v2 }
  0xc2   :  { %2115 = vmatmul.msk.f32.vlgmr.msrb.gmra.mxu1 %vm86_vm2, %v2113_v2 }
  0xc3   :  { %2121 = vmatmul.msk.f32.vlgmr.msra.gmra.mxu2 %vm86_vm2, %v2118_v1 }
  0xc4   :  { %v893_v57 = vpop.permute.xlu0 %892  ;;  %v895_v58 = vpop.permute.xlu1 %894 }
  0xc5   :  { %v904_v59 = vsel %vm900_vm8, %v899_v31, %v893_v57  ;;  %v902_v60 = vsel %vm900_vm8, %v895_v58, %v897_v41  ;;  %v903_v61 = vsel %vm900_vm8, %v893_v57, %v895_v58 }
  0xc6   :  { %v912_v62 = vmul.f32 %v2938_v48, %v904_v59  ;;  %v909_v5 = vmul.f32 %v2936_v49, %v903_v61  ;;  %v910_v6 = vmul.f32 %v2935_v53, %v902_v60 }
  0xc8   :  { %933 = vmatpush.msra.mxu0 %v909_v5  ;;  %953 = vmatpush.msra.mxu1 %v910_v6 }
  0xc9   :  { %993 = vmatpush.msra.mxu3 %v912_v62  ;;  %2119 = vmatmul.msk.f32.vlgmr.msra.gmra.mxu0 %vm86_vm2, %v2118_v1 }
  0xca   :  { %2120 = vmatmul.msk.f32.vlgmr.msra.gmra.mxu1 %vm86_vm2, %v2118_v1  ;;  %2122 = vmatmul.msk.f32.vlgmr.msra.gmra.mxu3 %vm86_vm2, %v2118_v1 }
  0xff   :  { %v107_v7 = vpop.f32.mrf.mxu0  ;;  %v127_v8 = vpop.f32.mrf.mxu1 }
 0x106   :  { %v147_v20 = vpop.f32.mrf.mxu2  ;;  %v167_v21 = vpop.f32.mrf.mxu3 }
 0x107   :  { %v190_v26 = vpop.f32.mrf.mxu0 }
 0x108   :  { %v210_v27 = vpop.f32.mrf.mxu1  ;;  %v191_v49 = vadd.f32 %v190_v26, %v107_v7 }
 0x109   :  { %v211_v32 = vadd.f32 %v210_v27, %v127_v8 }
 0x10e   :  { %v230_v28 = vpop.f32.mrf.mxu2 }
 0x10f   :  { %v250_v0 = vpop.f32.mrf.mxu3  ;;  %v296_v40 = vpop.f32.mrf.mxu0  ;;  %v231_v53 = vadd.f32 %v230_v28, %v147_v20 }
 0x110   :  { %v316_v41 = vpop.f32.mrf.mxu1  ;;  %v359_v9 = vadd.f32 %v296_v40, %v191_v49  ;;  %v251_v39 = vadd.f32 %v250_v0, %v167_v21 }
 0x111   :  { %v360_v29 = vadd.f32 %v316_v41, %v211_v32 }
 0x116   :  { %v336_v2 = vpop.f32.mrf.mxu2 }
 0x117   :  { %v356_v31 = vpop.f32.mrf.mxu3  ;;  %v361_v48 = vadd.f32 %v336_v2, %v231_v53 }
 0x118   :  { %v362_v63 = vadd.f32 %v356_v31, %v251_v39 }
 0x11e   :  { %v446_v42 = vpop.f32.mrf.mxu2  ;;  %v406_v45 = vpop.f32.mrf.mxu0 }
 0x11f   :  { %v466_v44 = vpop.f32.mrf.mxu3  ;;  %v426_v3 = vpop.f32.mrf.mxu1  ;;  %v471_v56 = vadd.f32 %v446_v42, %v361_v48  ;;  %v469_v55 = vadd.f32 %v406_v45, %v359_v9 }
 0x120   :  { %v470_v30 = vadd.f32 %v426_v3, %v360_v29  ;;  %v472_v7 = vadd.f32 %v466_v44, %v362_v63 }
 0x126   :  { %v535_v46 = vpop.f32.mrf.mxu2  ;;  %v495_v57 = vpop.f32.mrf.mxu0 }
 0x127   :  { %v555_v47 = vpop.f32.mrf.mxu3  ;;  %v515_v1 = vpop.f32.mrf.mxu1  ;;  %v560_v38 = vadd.f32 %v535_v46, %v471_v56  ;;  %v558_v35 = vadd.f32 %v495_v57, %v469_v55 }
 0x128   :  { %v559_v4 = vadd.f32 %v515_v1, %v470_v30  ;;  %v561_v49 = vadd.f32 %v555_v47, %v472_v7  ;;  %v2222_v1 = vmov 0  }
 0x129   :  { %2178 = vset.pattern.permute.xlu1 %v2222_v1  ;;  %2179 = vset.pattern.permute.xlu0 %v2222_v1 }
 0x12e   :  { %v645_v58 = vpop.f32.mrf.mxu2  ;;  %v605_v59 = vpop.f32.mrf.mxu0 }
 0x12f   :  { %v625_v60 = vpop.f32.mrf.mxu1  ;;  %v665_v61 = vpop.f32.mrf.mxu3  ;;  %v670_v23 = vadd.f32 %v645_v58, %v560_v38  ;;  %v668_v52 = vadd.f32 %v605_v59, %v558_v35 }
 0x130   :  { %v669_v20 = vadd.f32 %v625_v60, %v559_v4  ;;  %v671_v21 = vadd.f32 %v665_v61, %v561_v49  ;;  %v1014_v49 = vld [vmem:[%s2929_s3] sm:$0xff] }
 0x136   :  { %v755_v62 = vpop.f32.mrf.mxu2  ;;  %v715_v5 = vpop.f32.mrf.mxu0 }
 0x137   :  { %v735_v6 = vpop.f32.mrf.mxu1  ;;  %v775_v15 = vpop.f32.mrf.mxu3  ;;  %v780_v8 = vadd.f32 %v755_v62, %v670_v23  ;;  %v778_v53 = vadd.f32 %v715_v5, %v668_v52 }
 0x138   :  { %v779_v26 = vadd.f32 %v735_v6, %v669_v20  ;;  %v781_v39 = vadd.f32 %v775_v15, %v671_v21 }
 0x13e   :  { %v865_v43 = vpop.f32.mrf.mxu2  ;;  %v825_v54 = vpop.f32.mrf.mxu0 }
 0x13f   :  { %v845_v25 = vpop.f32.mrf.mxu1  ;;  %v890_v32 = vadd.f32 %v865_v43, %v780_v8  ;;  %v885_v48 = vpop.f32.mrf.mxu3  ;;  %v888_v9 = vadd.f32 %v825_v54, %v778_v53 }
 0x140   :  { %v889_v29 = vadd.f32 %v845_v25, %v779_v26  ;;  %v891_v52 = vadd.f32 %v885_v48, %v781_v39 }
 0x146   :  { %v975_v27 = vpop.f32.mrf.mxu2  ;;  %v935_v28 = vpop.f32.mrf.mxu0 }
 0x147   :  { %v1000_v56 = vadd.f32 %v975_v27, %v890_v32  ;;  %v955_v0 = vpop.f32.mrf.mxu1  ;;  %v998_v55 = vadd.f32 %v935_v28, %v888_v9  ;;  %v1015_v27 = vld [vmem:[%s2930_s4] sm:$0xff] }
 0x148   :  { %v999_v30 = vadd.f32 %v955_v0, %v889_v29 }
 0x149   :  { %v1008_v38 = vmul.f32 0.01, %v1000_v56  ;;  %vm1002_vm9 = vcmp.gt.f32.partialorder %v998_v55, 0.0  ;;  %v1006_v4 = vmul.f32 0.01, %v998_v55  ;;  %vm1004_vm11 = vcmp.gt.f32.partialorder %v1000_v56, 0.0 }
 0x14a   :  { %vm1003_vm10 = vcmp.gt.f32.partialorder %v999_v30, 0.0  ;;  %v1007_v63 = vmul.f32 0.01, %v999_v30 }
 0x14b   :  { %v1010_v23 = vsel %vm1002_vm9, %v998_v55, %v1006_v4  ;;  %v1012_v31 = vsel %vm1004_vm11, %v1000_v56, %v1008_v38 }
 0x14c   :  { %v1011_v35 = vsel %vm1003_vm10, %v999_v30, %v1007_v63  ;;  %v1016_v43 = vmul.f32 %v1010_v23, %v1010_v23  ;;  %v1018_v15 = vmul.f32 %v1012_v31, %v1012_v31 }
 0x14d   :  { %v1017_v54 = vmul.f32 %v1011_v35, %v1011_v35  ;;  %v995_v25 = vpop.f32.mrf.mxu3  ;;  %v1020_v2 = vadd.f32 %v1011_v35, %v1010_v23 }
 0x14e   :  { %v1001_v40 = vadd.f32 %v995_v25, %v891_v52 }
 0x14f   :  { %v1025_v41 = vadd.f32 %v1017_v54, %v1016_v43  ;;  %v1021_v44 = vadd.f32 %v1020_v2, %v1012_v31  ;;  %v2123_v2 = vld [vmem:[%s2931_s5 + $0x8] sm:$0xff] }
 0x150   :  { %vm1005_vm12 = vcmp.gt.f32.partialorder %v1001_v40, 0.0  ;;  %v1009_v42 = vmul.f32 0.01, %v1001_v40 }
 0x151   :  { %v1026_v47 = vadd.f32 %v1025_v41, %v1018_v15 }
 0x152   :  { %v1013_v45 = vsel %vm1005_vm12, %v1001_v40, %v1009_v42 }
 0x153   :  { %v1022_v3 = vadd.f32 %v1021_v44, %v1013_v45  ;;  %v1019_v46 = vmul.f32 %v1013_v45, %v1013_v45 }
 0x155   :  { %1023 = vadd.xlane.f32.xlu2 %v1022_v3  ;;  %v1027_v57 = vadd.f32 %v1026_v47, %v1019_v46 }
 0x157   :  { %1028 = vadd.xlane.f32.xlu0 %v1027_v57 }
 0x1c8   :  { %v1024_v58 = vpop.xlane.xlu2 %1023 }
 0x1c9   :  { %v1030_v59 = vmul.f32 0.001953125, %v1024_v58  ;;  %v1082_v58 = vld [vmem:[%s2931_s5] sm:$0xff] }
 0x1ca   :  { %v1029_v60 = vpop.xlane.xlu0 %1028 }
 0x1cb   :  { %v1032_v61 = vmul.f32 %v1030_v59, %v1030_v59  ;;  %v1031_v62 = vmul.f32 0.001953125, %v1029_v60 }
 0x1cd   :  { %v1033_v5 = vsub.f32 %v1031_v62, %v1032_v61 }
 0x1cf   :  { %v1034_v6 = vadd.f32 1e-05, %v1033_v5 }
 0x1d1   :  { %2180 = vrsqrt.f32 %v1034_v6  ;;  %vm1041_vm14 = vweird.f32 %v1034_v6 }
 0x1d7   :  { %v2181_v20 = vpop.eup %2180 }
 0x1d8   :  { %v1036_v7 = vmul.f32 %v2181_v20, %v1034_v6  ;;  %vm1042_vm13 = vweird.f32 %v2181_v20 }
 0x1d9   :  { %vm1043_vm15 = vmor %vm1041_vm14, %vm1042_vm13 }
 0x1da   :  { %v1037_v8 = vmul.f32 %v2181_v20, %v1036_v7 }
 0x1dc   :  { %v1038_v53 = vmul.f32 0.5, %v1037_v8 }
 0x1de   :  { %v1039_v26 = vsub.f32 1.5, %v1038_v53 }
 0x1e0   :  { %v1040_v32 = vmul.f32 %v2181_v20, %v1039_v26 }
 0x1e2   :  { %v1044_v48 = vsel %vm1043_vm15, %v2181_v20, %v1040_v32 }
 0x1e3   :  { %v1045_v9 = vmul.f32 %v1044_v48, %v1014_v49 }
 0x1e5   :  { %1050 = vperm.xlu1 %2178, %v1045_v9   ;;  %v1046_v29 = vmul.f32 %v1045_v9, %v1030_v59 }
 0x1e7   :  { %v1047_v21 = vsub.f32 %v1015_v27, %v1046_v29  ;;  %v2955_v27 = vperm.slane %v2371_v13, 2 }
 0x1ed   :  { %1059 = vperm.xlu1 %2178, %v1047_v21  }
 0x257   :  { %v1051_v56 = vpop.permute.xlu1 %1050 }
 0x258   :  { %v1053_v28 = vmul.f32 %v1051_v56, %v1010_v23  ;;  %v1054_v0 = vmul.f32 %v1051_v56, %v1011_v35  ;;  %v1055_v55 = vmul.f32 %v1051_v56, %v1012_v31  ;;  %v1056_v63 = vmul.f32 %v1051_v56, %v1013_v45 }
 0x259   :  { %v2956_v56 = vperm.slane %v2361_v11, 3 }
 0x25f   :  { %v1060_v30 = vpop.permute.xlu1 %1059 }
 0x260   :  { %v2629_v39 = vadd.f32 %v1060_v30, %v1053_v28  ;;  %v2631_v38 = vadd.f32 %v1060_v30, %v1054_v0  ;;  %v2633_v4 = vadd.f32 %v1060_v30, %v1055_v55  ;;  %v2647_v52 = vadd.f32 %v1060_v30, %v1056_v63 }
 0x261   :  { %v2957_v63 = vperm.slane %v2377_v14, 3 }
 0x262   :  { %1070 = vrot.lane.b32.xlu0 %v2633_v4, %s2215_s10  ;;  %1085 = vrot.lane.b32.xlu1 %v2631_v38, %s2214_s9 }
 0x263   :  { %1083 = vrot.lane.b32.xlu2 %v2629_v39, %s2214_s9 }
 0x26a   :  { %1271 = vrot.lane.b32.xlu0 %v2633_v4, %s2216_s15  ;;  %1087 = vrot.lane.b32.xlu1 %v2633_v4, %s2214_s9 }
 0x26b   :  { %1269 = vrot.lane.b32.xlu2 %v2631_v38, %s2216_s15 }
 0x272   :  { %1374 = vrot.lane.b32.xlu0 %v2631_v38, %s2217_s16  ;;  %1089 = vrot.lane.b32.xlu1 %v2647_v52, %s2214_s9 }
 0x273   :  { %1267 = vrot.lane.b32.xlu2 %v2629_v39, %s2216_s15 }
 0x27a   :  { %1068 = vrot.lane.b32.xlu1 %v2631_v38, %s2215_s10  ;;  %1372 = vrot.lane.b32.xlu0 %v2629_v39, %s2217_s16 }
 0x27b   :  { %1378 = vrot.lane.b32.xlu2 %v2647_v52, %s2217_s16 }
 0x282   :  { %1072 = vrot.lane.b32.xlu1 %v2647_v52, %s2215_s10  ;;  %1566 = vrot.lane.b32.xlu0 %v2629_v39, %s2218_s17 }
 0x283   :  { %1572 = vrot.lane.b32.xlu2 %v2647_v52, %s2218_s17 }
 0x28a   :  { %1677 = vrot.lane.b32.xlu0 %v2647_v52, %s2219_s18  ;;  %1066 = vrot.lane.b32.xlu1 %v2629_v39, %s2215_s10  ;;  %s2223_s10 = smov [#allocation2]  }
 0x28b   :  { %1675 = vrot.lane.b32.xlu2 %v2633_v4, %s2219_s18 }
 0x292   :  { %1780 = vrot.lane.b32.xlu0 %v2633_v4, %s2220_s19  ;;  %1273 = vrot.lane.b32.xlu1 %v2647_v52, %s2216_s15  ;;  %s2063_s15 = sshll.u32 %s2223_s10, 4  ;;  %s2064_s15 = int_to_ptr.vmem [resolvable:$true] %s2063_s15 }
 0x293   :  { %1673 = vrot.lane.b32.xlu2 %v2631_v38, %s2219_s18 }
 0x29a   :  { %1778 = vrot.lane.b32.xlu0 %v2631_v38, %s2220_s19  ;;  %1376 = vrot.lane.b32.xlu1 %v2633_v4, %s2217_s16 }
 0x29b   :  { %1776 = vrot.lane.b32.xlu2 %v2629_v39, %s2220_s19 }
 0x2a2   :  { %1881 = vrot.lane.b32.xlu0 %v2629_v39, %s2221_s20  ;;  %1570 = vrot.lane.b32.xlu1 %v2633_v4, %s2218_s17 }
 0x2a3   :  { %1887 = vrot.lane.b32.xlu2 %v2647_v52, %s2221_s20 }
 0x2aa   :  { %1568 = vrot.lane.b32.xlu1 %v2631_v38, %s2218_s17 }
 0x2b2   :  { %1671 = vrot.lane.b32.xlu1 %v2629_v39, %s2219_s18  ;;  %s2065_s18 = sshll.u32 %s2934_s8, 4  ;;  %s2066_s18 = int_to_ptr.hbm [resolvable:$true] %s2065_s18 }
 0x2ba   :  { %1782 = vrot.lane.b32.xlu1 %v2647_v52, %s2220_s19 }
 0x2bd   :  { %v1084_v23 = vpop.permute.xlu2 %1083 }
 0x2c2   :  { %1885 = vrot.lane.b32.xlu1 %v2633_v4, %s2221_s20 }
 0x2c5   :  { %v1270_v46 = vpop.permute.xlu2 %1269 }
 0x2ca   :  { %1883 = vrot.lane.b32.xlu1 %v2631_v38, %s2221_s20 }
 0x2cd   :  { %v1268_v59 = vpop.permute.xlu2 %1267 }
 0x2ce   :  { %v1277_v20 = vsel %vm261_vm3, %v1268_v59, %v1270_v46 }
 0x2cf   :  { %v1280_v32 = vmul.f32 %v1277_v20, %v267_v34 }
 0x2d4   :  { %v1086_v35 = vpop.permute.xlu1 %1085  ;;  %v1071_v54 = vpop.permute.xlu0 %1070 }
 0x2d5   :  { %v1093_v43 = vsel %vm71_vm0, %v1084_v23, %v1086_v35  ;;  %v1379_v5 = vpop.permute.xlu2 %1378 }
 0x2d6   :  { %v1096_v25 = vmul.f32 %v1093_v43, %v77_v17 }
 0x2d8   :  { %1139 = vmatpush.msrb.mxu1 %v1096_v25  ;;  %v2959_v25 = vperm.slane %v2371_v13, 4 }
 0x2d9   :  { %2125 = vmatmul.msk.f32.vlgmr.msrb.gmra.mxu1 %vm86_vm2, %v2123_v2 }
 0x2dc   :  { %v1088_v31 = vpop.permute.xlu1 %1087  ;;  %v1272_v42 = vpop.permute.xlu0 %1271 }
 0x2dd   :  { %v1092_v40 = vsel %vm71_vm0, %v1086_v35, %v1088_v31  ;;  %v1276_v47 = vsel %vm261_vm3, %v1270_v46, %v1272_v42  ;;  %v1573_v29 = vpop.permute.xlu2 %1572  ;;  %v2958_v35 = vperm.slane %v2371_v13, 3 }
 0x2de   :  { %v1097_v41 = vmul.f32 %v1092_v40, %v78_v18 }
 0x2e0   :  { %1159 = vmatpush.msrb.mxu2 %v1097_v41 }
 0x2e1   :  { %2126 = vmatmul.msk.f32.vlgmr.msrb.gmra.mxu2 %vm86_vm2, %v2123_v2 }
 0x2e4   :  { %v1090_v44 = vpop.permute.xlu1 %1089  ;;  %v1375_v18 = vpop.permute.xlu0 %1374 }
 0x2e5   :  { %v1091_v17 = vsel %vm71_vm0, %v1088_v31, %v1090_v44  ;;  %v1094_v15 = vsel %vm71_vm0, %v1090_v44, %v1084_v23  ;;  %v2960_v44 = vperm.slane %v2377_v14, 4 }
 0x2e6   :  { %v1095_v45 = vmul.f32 %v1094_v15, %v76_v16  ;;  %v1098_v3 = vmul.f32 %v1091_v17, %v79_v19  ;;  %v1281_v19 = vmul.f32 %v1276_v47, %v268_v50  ;;  %v2132_v50 = vld [vmem:[%s2931_s5 + $0x10] sm:$0xff]  ;;  %v2142_v15 = vld [vmem:[%s2931_s5 + $0x20] sm:$0xff] }
 0x2e8   :  { %1119 = vmatpush.msrb.mxu0 %v1095_v45  ;;  %1179 = vmatpush.msrb.mxu3 %v1098_v3 }
 0x2e9   :  { %2124 = vmatmul.msk.f32.vlgmr.msrb.gmra.mxu0 %vm86_vm2, %v2123_v2  ;;  %2127 = vmatmul.msk.f32.vlgmr.msrb.gmra.mxu3 %vm86_vm2, %v2123_v2 }
 0x2ec   :  { %v1069_v57 = vpop.permute.xlu1 %1068  ;;  %v1373_v60 = vpop.permute.xlu0 %1372 }
 0x2ed   :  { %v1075_v1 = vsel %vm49_vm1, %v1069_v57, %v1071_v54  ;;  %v1382_v8 = vsel %vm371_vm4, %v1373_v60, %v1375_v18 }
 0x2ee   :  { %v1080_v16 = vmul.f32 %v1075_v1, %v56_v22  ;;  %v1385_v48 = vmul.f32 %v1382_v8, %v377_v24  ;;  %v2962_v1 = vperm.slane %v2361_v11, 4  ;;  %v2966_v8 = vperm.slane %v2361_v11, 5 }
 0x2f0   :  { %1242 = vmatpush.msra.mxu2 %v1080_v16 }
 0x2f1   :  { %2130 = vmatmul.msk.f32.vlgmr.msra.gmra.mxu2 %vm86_vm2, %v1082_v58 }
 0x2f2   :  { %1343 = vmatpush.msrb.mxu2 %v1281_v19  ;;  %v2963_v19 = vperm.slane %v2366_v12, 4 }
 0x2f4   :  { %v1073_v61 = vpop.permute.xlu1 %1072  ;;  %v2753_v53 = vpop.permute.xlu0 %1566 }
 0x2f5   :  { %v1074_v62 = vsel %vm49_vm1, %v1071_v54, %v1073_v61  ;;  %v2137_v54 = vld [vmem:[%s2931_s5 + $0x18] sm:$0xff] }
 0x2f6   :  { %v1081_v22 = vmul.f32 %v1074_v62, %v57_v37 }
 0x2f8   :  { %1262 = vmatpush.msra.mxu3 %v1081_v22  ;;  %v2965_v22 = vperm.slane %v2366_v12, 6 }
 0x2f9   :  { %2131 = vmatmul.msk.f32.vlgmr.msra.gmra.mxu3 %vm86_vm2, %v1082_v58  ;;  %2135 = vmatmul.msk.f32.vlgmr.msrb.gmra.mxu2 %vm86_vm2, %v2132_v50 }
 0x2fc   :  { %v1067_v6 = vpop.permute.xlu1 %1066  ;;  %v2777_v0 = vpop.permute.xlu0 %1677 }
 0x2fd   :  { %v1076_v7 = vsel %vm49_vm1, %v1067_v6, %v1069_v57  ;;  %v1077_v37 = vsel %vm49_vm1, %v1073_v61, %v1067_v6  ;;  %v2964_v61 = vperm.slane %v2366_v12, 5 }
 0x2fe   :  { %v1078_v26 = vmul.f32 %v1077_v37, %v54_v33  ;;  %v1079_v49 = vmul.f32 %v1076_v7, %v55_v36  ;;  %v1383_v33 = vsel %vm371_vm4, %v1379_v5, %v1373_v60 }
 0x2ff   :  { %v1384_v28 = vmul.f32 %v1383_v33, %v2956_v56 }
 0x300   :  { %1202 = vmatpush.msra.mxu0 %v1078_v26  ;;  %1222 = vmatpush.msra.mxu1 %v1079_v49  ;;  %v2967_v26 = vperm.slane %v2371_v13, 5 }
 0x301   :  { %2128 = vmatmul.msk.f32.vlgmr.msra.gmra.mxu0 %vm86_vm2, %v1082_v58  ;;  %2129 = vmatmul.msk.f32.vlgmr.msra.gmra.mxu1 %vm86_vm2, %v1082_v58 }
 0x302   :  { %1323 = vmatpush.msrb.mxu1 %v1280_v32  ;;  %v2152_v32 = vld [vmem:[%s2931_s5 + $0x30] sm:$0xff] }
 0x304   :  { %1428 = vmatpush.msra.mxu1 %v1385_v48  ;;  %v1274_v9 = vpop.permute.xlu1 %1273  ;;  %v1781_v31 = vpop.permute.xlu0 %1780  ;;  %v2968_v48 = vperm.slane %v2361_v11, 6 }
 0x305   :  { %v1275_v36 = vsel %vm261_vm3, %v1272_v42, %v1274_v9  ;;  %v1278_v34 = vsel %vm261_vm3, %v1274_v9, %v1268_v59  ;;  %v2147_v59 = vld [vmem:[%s2931_s5 + $0x28] sm:$0xff] }
 0x306   :  { %v1279_v24 = vmul.f32 %v1278_v34, %v266_v51  ;;  %v1282_v21 = vmul.f32 %v1275_v36, %v2955_v27 }
 0x308   :  { %1303 = vmatpush.msrb.mxu0 %v1279_v24  ;;  %1363 = vmatpush.msrb.mxu3 %v1282_v21  ;;  %v2969_v21 = vperm.slane %v2377_v14, 6 }
 0x309   :  { %2133 = vmatmul.msk.f32.vlgmr.msrb.gmra.mxu0 %vm86_vm2, %v2132_v50  ;;  %2134 = vmatmul.msk.f32.vlgmr.msrb.gmra.mxu1 %vm86_vm2, %v2132_v50 }
 0x30a   :  { %2136 = vmatmul.msk.f32.vlgmr.msrb.gmra.mxu3 %vm86_vm2, %v2132_v50  ;;  %1408 = vmatpush.msra.mxu0 %v1384_v28  ;;  %v2970_v28 = vperm.slane %v2371_v13, 6 }
 0x30b   :  { %1517 = vmatpush.msrb.mxu1 %v2631_v38  ;;  %v1676_v38 = vpop.permute.xlu2 %1675 }
 0x30c   :  { %1497 = vmatpush.msrb.mxu0 %v2629_v39  ;;  %v1377_v51 = vpop.permute.xlu1 %1376  ;;  %v1577_v39 = vsel %vm570_vm5, %v1573_v29, %v2753_v53  ;;  %v1679_v42 = vsel %vm680_vm6, %v1676_v38, %v2777_v0  ;;  %v1779_v3 = vpop.permute.xlu0 %1778 }
 0x30d   :  { %v1380_v55 = vsel %vm371_vm4, %v1377_v51, %v1379_v5  ;;  %v1381_v30 = vsel %vm371_vm4, %v1375_v18, %v1377_v51  ;;  %v1581_v2 = vmul.f32 %v1577_v39, %v2959_v25  ;;  %v1785_v60 = vsel %vm790_vm7, %v1779_v3, %v1781_v31  ;;  %v2157_v51 = vld [vmem:[%s2931_s5 + $0x38] sm:$0xff] }
 0x30e   :  { %v1386_v23 = vmul.f32 %v1381_v30, %v2957_v63  ;;  %v1387_v43 = vmul.f32 %v1380_v55, %v2958_v35  ;;  %v1789_v50 = vmul.f32 %v1785_v60, %v2965_v22  ;;  %v2971_v55 = vperm.slane %v2371_v13, 7  ;;  %v2162_v13 = vld [vmem:[%s2931_s5 + $0x40] sm:$0xff] }
 0x30f   :  { %v2972_v35 = vperm.slane %v2377_v14, 7  ;;  %v2973_v25 = vperm.slane %v2361_v11, 7 }
 0x310   :  { %1448 = vmatpush.msra.mxu2 %v1386_v23  ;;  %1468 = vmatpush.msra.mxu3 %v1387_v43 }
 0x311   :  { %2138 = vmatmul.msk.f32.vlgmr.msra.gmra.mxu0 %vm86_vm2, %v2137_v54  ;;  %2139 = vmatmul.msk.f32.vlgmr.msra.gmra.mxu1 %vm86_vm2, %v2137_v54 }
 0x312   :  { %2140 = vmatmul.msk.f32.vlgmr.msra.gmra.mxu2 %vm86_vm2, %v2137_v54  ;;  %2141 = vmatmul.msk.f32.vlgmr.msra.gmra.mxu3 %vm86_vm2, %v2137_v54 }
 0x313   :  { %1537 = vmatpush.msrb.mxu2 %v2633_v4  ;;  %1557 = vmatpush.msrb.mxu3 %v2647_v52  ;;  %v1674_v4 = vpop.permute.xlu2 %1673  ;;  %v2961_v52 = vperm.slane %v2377_v14, 5 }
 0x314   :  { %v1571_v40 = vpop.permute.xlu1 %1570  ;;  %v1680_v57 = vsel %vm680_vm6, %v1674_v4, %v1676_v38 }
 0x315   :  { %1662 = vmatpush.msra.mxu3 %v1581_v2  ;;  %v1574_v41 = vsel %vm570_vm5, %v1571_v40, %v1573_v29  ;;  %v1685_v45 = vmul.f32 %v1679_v42, %v2961_v52  ;;  %v1684_v62 = vmul.f32 %v1680_v57, %v2964_v61  ;;  %v1882_v29 = vpop.permute.xlu0 %1881  ;;  %v2974_v2 = vperm.slane %v2366_v12, 7 }
 0x316   :  { %v1580_v17 = vmul.f32 %v1574_v41, %v2960_v44 }
 0x318   :  { %1642 = vmatpush.msra.mxu2 %v1580_v17 }
 0x319   :  { %2143 = vmatmul.msk.f32.vlgmr.msrb.gmra.mxu0 %vm86_vm2, %v2142_v15  ;;  %2144 = vmatmul.msk.f32.vlgmr.msrb.gmra.mxu1 %vm86_vm2, %v2142_v15 }
 0x31a   :  { %2145 = vmatmul.msk.f32.vlgmr.msrb.gmra.mxu2 %vm86_vm2, %v2142_v15  ;;  %2146 = vmatmul.msk.f32.vlgmr.msrb.gmra.mxu3 %vm86_vm2, %v2142_v15 }
 0x31b   :  { %1747 = vmatpush.msrb.mxu2 %v1685_v45  ;;  %v1777_v5 = vpop.permute.xlu2 %1776 }
 0x31c   :  { %v1569_v46 = vpop.permute.xlu1 %1568  ;;  %v1786_v37 = vsel %vm790_vm7, %v1777_v5, %v1779_v3 }
 0x31d   :  { %v1575_v18 = vsel %vm570_vm5, %v1569_v46, %v1571_v40  ;;  %v1576_v47 = vsel %vm570_vm5, %v2753_v53, %v1569_v46  ;;  %v1788_v9 = vmul.f32 %v1786_v37, %v2968_v48 }
 0x31e   :  { %v1578_v16 = vmul.f32 %v1576_v47, %v2962_v1  ;;  %v1579_v58 = vmul.f32 %v1575_v18, %v2963_v19 }
 0x320   :  { %1602 = vmatpush.msra.mxu0 %v1578_v16  ;;  %1622 = vmatpush.msra.mxu1 %v1579_v58 }
 0x321   :  { %2148 = vmatmul.msk.f32.vlgmr.msra.gmra.mxu0 %vm86_vm2, %v2147_v59  ;;  %2149 = vmatmul.msk.f32.vlgmr.msra.gmra.mxu1 %vm86_vm2, %v2147_v59 }
 0x322   :  { %2150 = vmatmul.msk.f32.vlgmr.msra.gmra.mxu2 %vm86_vm2, %v2147_v59  ;;  %2151 = vmatmul.msk.f32.vlgmr.msra.gmra.mxu3 %vm86_vm2, %v2147_v59 }
 0x323   :  { %1727 = vmatpush.msrb.mxu1 %v1684_v62  ;;  %v1888_v36 = vpop.permute.xlu2 %1887 }
 0x324   :  { %v1672_v6 = vpop.permute.xlu1 %1671  ;;  %v1892_v27 = vsel %vm900_vm8, %v1888_v36, %v1882_v29 }
 0x325   :  { %1832 = vmatpush.msra.mxu1 %v1789_v50  ;;  %v1681_v20 = vsel %vm680_vm6, %v1672_v6, %v1674_v4  ;;  %v1682_v7 = vsel %vm680_vm6, %v2777_v0, %v1672_v6  ;;  %v1896_v30 = vmul.f32 %v1892_v27, %v2971_v55 }
 0x326   :  { %v1683_v53 = vmul.f32 %v1681_v20, %v2966_v8  ;;  %v1686_v49 = vmul.f32 %v1682_v7, %v2967_v26 }
 0x328   :  { %1707 = vmatpush.msrb.mxu0 %v1683_v53  ;;  %1767 = vmatpush.msrb.mxu3 %v1686_v49 }
 0x329   :  { %2153 = vmatmul.msk.f32.vlgmr.msrb.gmra.mxu0 %vm86_vm2, %v2152_v32  ;;  %2154 = vmatmul.msk.f32.vlgmr.msrb.gmra.mxu1 %vm86_vm2, %v2152_v32 }
 0x32a   :  { %2155 = vmatmul.msk.f32.vlgmr.msrb.gmra.mxu2 %vm86_vm2, %v2152_v32  ;;  %2156 = vmatmul.msk.f32.vlgmr.msrb.gmra.mxu3 %vm86_vm2, %v2152_v32 }
 0x32b   :  { %1812 = vmatpush.msra.mxu0 %v1788_v9 }
 0x32c   :  { %v1783_v33 = vpop.permute.xlu1 %1782 }
 0x32d   :  { %v1784_v34 = vsel %vm790_vm7, %v1781_v31, %v1783_v33  ;;  %v1787_v24 = vsel %vm790_vm7, %v1783_v33, %v1777_v5 }
 0x32e   :  { %v1790_v56 = vmul.f32 %v1784_v34, %v2969_v21  ;;  %v1791_v0 = vmul.f32 %v1787_v24, %v2970_v28 }
 0x330   :  { %1852 = vmatpush.msra.mxu2 %v1790_v56  ;;  %1872 = vmatpush.msra.mxu3 %v1791_v0 }
 0x331   :  { %2158 = vmatmul.msk.f32.vlgmr.msra.gmra.mxu0 %vm86_vm2, %v2157_v51  ;;  %2159 = vmatmul.msk.f32.vlgmr.msra.gmra.mxu1 %vm86_vm2, %v2157_v51 }
 0x332   :  { %2160 = vmatmul.msk.f32.vlgmr.msra.gmra.mxu2 %vm86_vm2, %v2157_v51  ;;  %2161 = vmatmul.msk.f32.vlgmr.msra.gmra.mxu3 %vm86_vm2, %v2157_v51 }
 0x333   :  { %1977 = vmatpush.msrb.mxu3 %v1896_v30 }
 0x334   :  { %v1886_v63 = vpop.permute.xlu1 %1885 }
 0x335   :  { %v1889_v23 = vsel %vm900_vm8, %v1886_v63, %v1888_v36 }
 0x336   :  { %v1895_v43 = vmul.f32 %v1889_v23, %v2972_v35 }
 0x338   :  { %1957 = vmatpush.msrb.mxu2 %v1895_v43 }
 0x33a   :  { %2165 = vmatmul.msk.f32.vlgmr.msrb.gmra.mxu2 %vm86_vm2, %v2162_v13  ;;  %2166 = vmatmul.msk.f32.vlgmr.msrb.gmra.mxu3 %vm86_vm2, %v2162_v13 }
 0x33c   :  { %v1884_v54 = vpop.permute.xlu1 %1883 }
 0x33d   :  { %v1890_v38 = vsel %vm900_vm8, %v1884_v54, %v1886_v63  ;;  %v1891_v39 = vsel %vm900_vm8, %v1882_v29, %v1884_v54 }
 0x33e   :  { %v1893_v14 = vmul.f32 %v1891_v39, %v2973_v25  ;;  %v1894_v31 = vmul.f32 %v1890_v38, %v2974_v2 }
 0x340   :  { %1917 = vmatpush.msrb.mxu0 %v1893_v14  ;;  %1937 = vmatpush.msrb.mxu1 %v1894_v31 }
 0x341   :  { %2163 = vmatmul.msk.f32.vlgmr.msrb.gmra.mxu0 %vm86_vm2, %v2162_v13  ;;  %2164 = vmatmul.msk.f32.vlgmr.msrb.gmra.mxu1 %vm86_vm2, %v2162_v13 }
 0x356   :  { %v1141_v41 = vpop.f32.mrf.mxu1 }
 0x364   :  { %v1161_v42 = vpop.f32.mrf.mxu2 }
 0x366   :  { %v1121_v40 = vpop.f32.mrf.mxu0 }
 0x36c   :  { %v1181_v44 = vpop.f32.mrf.mxu3 }
 0x374   :  { %v1244_v10 = vpop.f32.mrf.mxu2 }
 0x375   :  { %v1245_v6 = vadd.f32 %v1244_v10, %v1161_v42 }
 0x37c   :  { %v1264_v4 = vpop.f32.mrf.mxu3  ;;  %v1345_v45 = vpop.f32.mrf.mxu2 }
 0x37d   :  { %v1265_v37 = vadd.f32 %v1264_v4, %v1181_v44  ;;  %v1370_v26 = vadd.f32 %v1345_v45, %v1245_v6 }
 0x37e   :  { %v1204_v17 = vpop.f32.mrf.mxu0  ;;  %v1224_v15 = vpop.f32.mrf.mxu1 }
 0x37f   :  { %v1205_v20 = vadd.f32 %v1204_v17, %v1121_v40  ;;  %v1225_v7 = vadd.f32 %v1224_v15, %v1141_v41 }
 0x386   :  { %v1305_v52 = vpop.f32.mrf.mxu0  ;;  %v1325_v11 = vpop.f32.mrf.mxu1 }
 0x387   :  { %v1368_v8 = vadd.f32 %v1305_v52, %v1205_v20  ;;  %v1369_v53 = vadd.f32 %v1325_v11, %v1225_v7 }
 0x38d   :  { %v1365_v3 = vpop.f32.mrf.mxu3 }
 0x38e   :  { %v1410_v12 = vpop.f32.mrf.mxu0  ;;  %v1430_v46 = vpop.f32.mrf.mxu1  ;;  %v1371_v49 = vadd.f32 %v1365_v3, %v1265_v37  ;;  %v1987_v37 = vld [vmem:[%s2933_s7] sm:$0xff] }
 0x38f   :  { %v1473_v32 = vadd.f32 %v1410_v12, %v1368_v8  ;;  %v1474_v48 = vadd.f32 %v1430_v46, %v1369_v53 }
 0x395   :  { %v1450_v18 = vpop.f32.mrf.mxu2  ;;  %v1470_v47 = vpop.f32.mrf.mxu3 }
 0x396   :  { %v1499_v57 = vpop.f32.mrf.mxu0  ;;  %v1519_v1 = vpop.f32.mrf.mxu1  ;;  %v1475_v9 = vadd.f32 %v1450_v18, %v1370_v26  ;;  %v1476_v24 = vadd.f32 %v1470_v47, %v1371_v49 }
 0x397   :  { %v1562_v27 = vadd.f32 %v1499_v57, %v1473_v32  ;;  %v1563_v21 = vadd.f32 %v1519_v1, %v1474_v48 }
 0x39d   :  { %v1539_v16 = vpop.f32.mrf.mxu2  ;;  %v1559_v19 = vpop.f32.mrf.mxu3 }
 0x39e   :  { %v1604_v58 = vpop.f32.mrf.mxu0  ;;  %v1624_v59 = vpop.f32.mrf.mxu1  ;;  %v1564_v56 = vadd.f32 %v1539_v16, %v1475_v9  ;;  %v1565_v28 = vadd.f32 %v1559_v19, %v1476_v24  ;;  %v2184_v24 = vld [vmem:[%s2926_s0] sm:$0xff] }
 0x39f   :  { %v1667_v0 = vadd.f32 %v1604_v58, %v1562_v27  ;;  %v1668_v51 = vadd.f32 %v1624_v59, %v1563_v21  ;;  %v2185_v21 = vld [vmem:[%s2926_s0 + $0x8] sm:$0xff] }
 0x3a5   :  { %v1644_v60 = vpop.f32.mrf.mxu2  ;;  %v1664_v61 = vpop.f32.mrf.mxu3 }
 0x3a6   :  { %v1709_v62 = vpop.f32.mrf.mxu0  ;;  %v1729_v22 = vpop.f32.mrf.mxu1  ;;  %v1669_v55 = vadd.f32 %v1644_v60, %v1564_v56  ;;  %v1670_v30 = vadd.f32 %v1664_v61, %v1565_v28  ;;  %v2186_v28 = vld [vmem:[%s2926_s0 + $0x10] sm:$0xff] }
 0x3a7   :  { %v1772_v63 = vadd.f32 %v1709_v62, %v1667_v0  ;;  %v1773_v23 = vadd.f32 %v1729_v22, %v1668_v51  ;;  %v2187_v51 = vld [vmem:[%s2926_s0 + $0x18] sm:$0xff]  ;;  %s2224_s0 = smov 256  }
 0x3ad   :  { %v1749_v50 = vpop.f32.mrf.mxu2  ;;  %v1769_v5 = vpop.f32.mrf.mxu3 }
 0x3ae   :  { %v1814_v36 = vpop.f32.mrf.mxu0  ;;  %v1834_v34 = vpop.f32.mrf.mxu1  ;;  %v1774_v35 = vadd.f32 %v1749_v50, %v1669_v55  ;;  %v1775_v43 = vadd.f32 %v1769_v5, %v1670_v30  ;;  %v1986_v50 = vld [vmem:[%s2932_s6] sm:$0xff] }
 0x3af   :  { %v1877_v13 = vadd.f32 %v1814_v36, %v1772_v63  ;;  %v1878_v54 = vadd.f32 %v1834_v34, %v1773_v23 }
 0x3b5   :  { %v1854_v29 = vpop.f32.mrf.mxu2  ;;  %v1874_v33 = vpop.f32.mrf.mxu3 }
 0x3b6   :  { %v1879_v38 = vadd.f32 %v1854_v29, %v1774_v35  ;;  %v1880_v31 = vadd.f32 %v1874_v33, %v1775_v43 }
 0x3bd   :  { %v1959_v39 = vpop.f32.mrf.mxu2  ;;  %v1979_v25 = vpop.f32.mrf.mxu3 }
 0x3be   :  { %v1919_v14 = vpop.f32.mrf.mxu0  ;;  %v1939_v2 = vpop.f32.mrf.mxu1  ;;  %v1984_v40 = vadd.f32 %v1959_v39, %v1879_v38  ;;  %v1985_v44 = vadd.f32 %v1979_v25, %v1880_v31 }
 0x3bf   :  { %v1982_v41 = vadd.f32 %v1919_v14, %v1877_v13  ;;  %v1983_v42 = vadd.f32 %v1939_v2, %v1878_v54 }
 0x3c0   :  { %v1990_v4 = vmul.f32 %v1984_v40, %v1984_v40  ;;  %v1991_v3 = vmul.f32 %v1985_v44, %v1985_v44 }
 0x3c1   :  { %v1988_v17 = vmul.f32 %v1982_v41, %v1982_v41  ;;  %v1989_v15 = vmul.f32 %v1983_v42, %v1983_v42  ;;  %v1992_v10 = vadd.f32 %v1983_v42, %v1982_v41 }
 0x3c3   :  { %v1993_v52 = vadd.f32 %v1992_v10, %v1984_v40  ;;  %v1997_v11 = vadd.f32 %v1989_v15, %v1988_v17 }
 0x3c5   :  { %v1994_v45 = vadd.f32 %v1993_v52, %v1985_v44  ;;  %v1998_v12 = vadd.f32 %v1997_v11, %v1990_v4 }
 0x3c7   :  { %1995 = vadd.xlane.f32.xlu2 %v1994_v45  ;;  %v1999_v46 = vadd.f32 %v1998_v12, %v1991_v3 }
 0x3c9   :  { %2000 = vadd.xlane.f32.xlu0 %v1999_v46 }
 0x43a   :  { %v1996_v18 = vpop.xlane.xlu2 %1995 }
 0x43b   :  { %v2002_v47 = vmul.f32 0.001953125, %v1996_v18 }
 0x43c   :  { %v2001_v57 = vpop.xlane.xlu0 %2000 }
 0x43d   :  { %v2004_v1 = vmul.f32 %v2002_v47, %v2002_v47  ;;  %v2003_v16 = vmul.f32 0.001953125, %v2001_v57 }
 0x43f   :  { %v2005_v19 = vsub.f32 %v2003_v16, %v2004_v1 }
 0x441   :  { %v2006_v58 = vadd.f32 1e-05, %v2005_v19 }
 0x443   :  { %2182 = vrsqrt.f32 %v2006_v58  ;;  %vm2013_vm1 = vweird.f32 %v2006_v58 }
 0x449   :  { %v2183_v59 = vpop.eup %2182 }
 0x44a   :  { %v2008_v60 = vmul.f32 %v2183_v59, %v2006_v58  ;;  %vm2014_vm0 = vweird.f32 %v2183_v59 }
 0x44b   :  { %vm2015_vm2 = vmor %vm2013_vm1, %vm2014_vm0 }
 0x44c   :  { %v2009_v61 = vmul.f32 %v2183_v59, %v2008_v60 }
 0x44e   :  { %v2010_v62 = vmul.f32 0.5, %v2009_v61 }
 0x450   :  { %v2011_v22 = vsub.f32 1.5, %v2010_v62 }
 0x452   :  { %v2012_v5 = vmul.f32 %v2183_v59, %v2011_v22 }
 0x454   :  { %v2016_v6 = vsel %vm2015_vm2, %v2183_v59, %v2012_v5 }
 0x455   :  { %v2017_v20 = vmul.f32 %v2016_v6, %v1986_v50 }
 0x457   :  { %2022 = vperm.xlu1 %2178, %v2017_v20   ;;  %v2018_v7 = vmul.f32 %v2017_v20, %v2002_v47 }
 0x459   :  { %v2019_v8 = vsub.f32 %v1987_v37, %v2018_v7 }
 0x45f   :  { %2031 = vperm.xlu1 %2178, %v2019_v8  }
 0x4c9   :  { %v2023_v53 = vpop.permute.xlu1 %2022 }
 0x4ca   :  { %v2025_v26 = vmul.f32 %v2023_v53, %v1982_v41  ;;  %v2026_v49 = vmul.f32 %v2023_v53, %v1983_v42  ;;  %v2027_v32 = vmul.f32 %v2023_v53, %v1984_v40  ;;  %v2028_v48 = vmul.f32 %v2023_v53, %v1985_v44 }
 0x4d1   :  { %v2032_v9 = vpop.permute.xlu1 %2031 }
 0x4d2   :  { %v2034_v29 = vadd.f32 %v2032_v9, %v2025_v26  ;;  %v2035_v33 = vadd.f32 %v2032_v9, %v2026_v49  ;;  %v2036_v36 = vadd.f32 %v2032_v9, %v2027_v32  ;;  %v2037_v34 = vadd.f32 %v2032_v9, %v2028_v48 }
 0x4d4   :  { %v2038_v27 = vadd.f32 %v2184_v24, %v2034_v29  ;;  %v2039_v56 = vadd.f32 %v2185_v21, %v2035_v33  ;;  %v2040_v0 = vadd.f32 %v2186_v28, %v2036_v36  ;;  %v2041_v55 = vadd.f32 %v2187_v51, %v2037_v34 }
 0x4d6   :  { %vm2042_vm3 = vcmp.gt.f32.partialorder %v2038_v27, 0.0  ;;  %vm2043_vm4 = vcmp.gt.f32.partialorder %v2039_v56, 0.0  ;;  %vm2044_vm5 = vcmp.gt.f32.partialorder %v2040_v0, 0.0  ;;  %vm2045_vm6 = vcmp.gt.f32.partialorder %v2041_v55, 0.0 }
 0x4d7   :  { %v2046_v30 = vmul.f32 0.01, %v2038_v27  ;;  %v2047_v63 = vmul.f32 0.01, %v2039_v56  ;;  %v2048_v23 = vmul.f32 0.01, %v2040_v0 }
 0x4d8   :  { %v2049_v35 = vmul.f32 0.01, %v2041_v55 }
 0x4d9   :  { %v2050_v43 = vsel %vm2042_vm3, %v2038_v27, %v2046_v30  ;;  %v2051_v13 = vsel %vm2043_vm4, %v2039_v56, %v2047_v63  ;;  %v2052_v54 = vsel %vm2044_vm5, %v2040_v0, %v2048_v23 }
 0x4da   :  { %v2053_v38 = vsel %vm2045_vm6, %v2041_v55, %v2049_v35  ;;  %2054 = vst [vmem:[#allocation2] sm:$0xff] %v2050_v43 }
 0x4db   :  { %2055 = vst [vmem:[#allocation2 + $0x8] sm:$0xff] %v2051_v13 }
 0x4dc   :  { %2057 = vst [vmem:[#allocation2 + $0x10] sm:$0xff] %v2052_v54 }
 0x4dd   :  { %2058 = vst [vmem:[#allocation2 + $0x18] sm:$0xff] %v2053_v38 }
 0x4de   :  { %2071 = dma.vmem_to_hbm [thread:$0]  %s2064_s15, 512, %s2066_s18, [#allocation3], %s2224_s0, %s2224_s0, %s2214_s9  }
 0x4df   :  { %2212 = dma.done.wait [#allocation3], 512  }
 0x4e0   :  { %2213 = vsyncadd [#allocation3], 4294966784 }
 0x4e1   :  { %2076 = vsyncpa [#allocation3], 1 }

</bundles_post_ra>
